<compile_context>
chip_gen: v7x
topology: tpu7x:2x2x1
jax: 0.10.0
libtpu: 0.0.40
codegen_flags: <defaults>
</compile_context>

<pallas_src>
import math
import functools

import jax
import jax.numpy as jnp
from jax.experimental import pallas as pl
from jax.experimental.pallas import tpu as pltpu

_INV_SQRT_2PI = 1.0 / math.sqrt(2.0 * math.pi)
_INV_SQRT2 = 1.0 / math.sqrt(2.0)
_LN_EPS = 1e-5      # torch.nn.LayerNorm default eps


def _round_up(x, m):
    return ((x + m - 1) // m) * m


def _gelu(x):
    # exact erf-based GELU (torch.nn.GELU() default)
    return 0.5 * x * (1.0 + jax.lax.erf(x * _INV_SQRT2))


def _layer_norm(x, eps=_LN_EPS):
    # LayerNorm over last dim, elementwise_affine=False (biased variance)
    m = jnp.mean(x, axis=-1, keepdims=True)
    v = jnp.mean((x - m) ** 2, axis=-1, keepdims=True)
    return (x - m) * jax.lax.rsqrt(v + eps)


def _bf16_dot(a_f32, w_bf16_ref, b_f32_ref):
    # bf16 x bf16 matmul with f32 accumulation, f32 bias add
    return jnp.dot(a_f32.astype(jnp.bfloat16), w_bf16_ref[...],
                   preferred_element_type=jnp.float32) + b_f32_ref[...]


def decoder_network_kernel(n_components, kl_multiplier, vocab_size, tile_v,
                           needs_mask,
                           # inputs
                           x_bow_ref, x_bert_ref, eps_ref, sbow_ref,
                           w1_ref, b1_ref, w2_ref, b2_ref, w3_ref, b3_ref,
                           beta_ref, rowsum_ref, gram_ref,
                           prior_mean_ref, prior_var_ref,
                           # output
                           loss_ref,
                           # scratch
                           policy_s, kl_s, mean_s, rstd_s,
                           m_s, sumexp_s, a_s):
    v = pl.program_id(1)            # vocab tile index
    nv = pl.num_programs(1)
    K = n_components

    @pl.when(v == 0)
    def _init_and_inference():
        # ---- fused mu | log_sigma inference MLP (3 matmuls total) ----
        x = x_bert_ref[...]
        h = _gelu(_bf16_dot(x, w1_ref, b1_ref))          # [TB, 2*h1]
        h = _gelu(_bf16_dot(h, w2_ref, b2_ref))          # [TB, 2*h2]
        # TODO(synk): inference dropout (p=0.2) is train-mode only; eval-mode
        # identity is used here.
        out = _bf16_dot(h, w3_ref, b3_ref)               # [TB, 2*K]
        mu = out[:, :K]
        log_sigma = _layer_norm(out[:, K:])              # posterior_log_sigma

        # ---- policy pdf: action - mu == sigma * eps exactly ----
        eps = eps_ref[...]
        policy = _INV_SQRT_2PI * jnp.exp(-0.5 * eps * eps - log_sigma)
        policy_s[...] = policy

        # ---- KL(posterior || prior), literal octis formula:
        #      p_variance = exp(log_sigma); both variances squared inside ----
        q_mean = prior_mean_ref[...]                     # [1, K]
        q_var = prior_var_ref[...]                       # [1, K]
        qv2 = q_var * q_var
        inv_qv2 = 1.0 / qv2
        var_div = jnp.sum(jnp.exp(2.0 * log_sigma) * inv_qv2,
                          axis=-1, keepdims=True)
        diff = jnp.sum((q_mean - mu) ** 2 * inv_qv2, axis=-1, keepdims=True)
        logdet = jnp.sum(jnp.log(qv2) - 2.0 * log_sigma,
                         axis=-1, keepdims=True)
        kl_s[...] = 0.5 * (var_div + diff - float(K) + logdet)

        # ---- analytic LayerNorm stats of logits = policy @ beta ----
        #   s1 = policy . beta_rowsum ;  s2 = policy (beta beta^T) policy^T
        inv_v = 1.0 / float(vocab_size)
        s1 = jnp.sum(policy * rowsum_ref[...], axis=-1, keepdims=True)
        pg = jnp.dot(policy, gram_ref[...],
                     preferred_element_type=jnp.float32)     # [TB, K]
        s2 = jnp.sum(pg * policy, axis=-1, keepdims=True)
        mean = s1 * inv_v
        # NOTE: E[x^2]-E[x]^2 can cancel if logits acquire a large common
        # offset relative to their spread; fine at 0.02-scale beta.
        var = s2 * inv_v - mean * mean
        mean_s[...] = mean
        rstd_s[...] = jax.lax.rsqrt(var + _LN_EPS)

        # ---- streaming (online logsumexp) accumulators ----
        m_s[...] = jnp.full_like(m_s, -jnp.inf)
        sumexp_s[...] = jnp.zeros_like(sumexp_s)
        a_s[...] = jnp.zeros_like(a_s)

    # ---- single streaming pass over the vocab ----
    logits = jnp.dot(policy_s[...].astype(jnp.bfloat16), beta_ref[...],
                     preferred_element_type=jnp.float32)     # [TB, TILE_V]
    t = (logits - mean_s[...]) * rstd_s[...]                 # normalized
    if needs_mask:
        col = v * tile_v + jax.lax.broadcasted_iota(jnp.int32, (1, tile_v), 1)
        t_m = jnp.where(col < vocab_size, t, -jnp.inf)       # mask padded lanes
    else:
        t_m = t
    m_new = jnp.maximum(m_s[...], jnp.max(t_m, axis=-1, keepdims=True))
    sumexp_s[...] = (sumexp_s[...] * jnp.exp(m_s[...] - m_new)
                     + jnp.sum(jnp.exp(t_m - m_new), axis=-1, keepdims=True))
    bow = x_bow_ref[...].astype(jnp.float32)      # padded lanes are zero
    a_s[...] += jnp.sum(bow * t, axis=-1, keepdims=True)
    m_s[...] = m_new

    @pl.when(v == nv - 1)
    def _finalize():
        lse = m_s[...] + jnp.log(sumexp_s[...])
        # TODO(synk): log(softmax + 1e-8) is fused to log-softmax; the 1e-8
        # epsilon inside the log is dropped (negligible for non-degenerate
        # word probabilities).
        nll = lse * sbow_ref[...] - a_s[...]          # -sum(bow * log softmax)
        reward = nll + kl_multiplier * kl_s[...]      # [TB, 1]
        loss_ref[...] = jnp.broadcast_to(
            jnp.sum(reward, axis=0, keepdims=True), loss_ref.shape)


def _choose_tile_b(B, max_tile=256):
    """Batch tile: multiple of 8 dividing B (or B itself)."""
    if B <= max_tile or B % 8 != 0:
        return B
    t = (max_tile // 8) * 8
    while t >= 8:
        if B % t == 0:
            return t
        t -= 8
    return B


def _vmem_limit_bytes():
    """Generation-aware VMEM limit (~3/4 of capacity, capped at 100 MiB)."""
    try:
        cap = int(pltpu.get_tpu_info().vmem_capacity_bytes)
        return max(32 * 1024 * 1024, min(cap * 3 // 4, 100 * 1024 * 1024))
    except Exception:
        return 48 * 1024 * 1024   # safe on v5e / v6e / v7x


def decoder_network_forward(params, x_bow, x_bert, eps, n_components,
                            kl_multiplier, *, tile_v=None, tile_b=None):
    B, V = x_bow.shape
    _, bert = x_bert.shape
    K = int(n_components)

    # ---- vocab tiling (pad V up; mask padded lanes in-kernel) ----
    if tile_v is None:
        tile_v = min(_round_up(V, 128), 8192)
    else:
        tile_v = min(_round_up(int(tile_v), 128), _round_up(V, 128))
    V_pad = _round_up(V, tile_v)
    nv = V_pad // tile_v
    needs_mask = V_pad != V

    # ---- batch tiling (leading "parallel" grid axis) ----
    if tile_b is None:
        tile_b = _choose_tile_b(B)
    assert B % tile_b == 0, "batch must be divisible by tile_b"
    assert tile_b == B or tile_b % 8 == 0
    nb = B // tile_b
    TB = tile_b

    bf16 = jnp.bfloat16
    w1m, w1s = params["w1m"], params["w1s"]
    w2m, w2s = params["w2m"], params["w2s"]
    w3m, w3s = params["w3m"], params["w3s"]
    h1, h2 = w1m.shape[1], w2m.shape[1]

    # Fuse the mu / log_sigma MLPs: concat layer-1 columns, block-diagonal
    # layers 2 and 3.  Weights go to bf16 (MXU-native, f32 accumulation).
    w1 = jnp.concatenate([w1m, w1s], axis=1).astype(bf16)             # [bert, 2h1]
    b1 = jnp.concatenate([params["b1m"], params["b1s"]], axis=1)      # [1, 2h1]
    z22 = jnp.zeros((h1, h2), jnp.float32)
    w2 = jnp.block([[w2m, z22], [z22, w2s]]).astype(bf16)             # [2h1, 2h2]
    b2 = jnp.concatenate([params["b2m"], params["b2s"]], axis=1)      # [1, 2h2]
    z3 = jnp.zeros((h2, K), jnp.float32)
    w3 = jnp.block([[w3m, z3], [z3, w3s]]).astype(bf16)               # [2h2, 2K]
    b3 = jnp.concatenate([params["b3m"], params["b3s"]], axis=1)      # [1, 2K]

    # beta: bf16 + zero-padded columns; analytic LayerNorm-stat helpers
    beta16 = jnp.pad(params["beta"], ((0, 0), (0, V_pad - V))).astype(bf16)
    beta_f = beta16.astype(jnp.float32)
    rowsum = jnp.sum(beta_f, axis=1)[None, :]                         # [1, K]
    gram = jnp.dot(beta_f, beta_f.T)                                  # [K, K]

    sbow = jnp.sum(x_bow, axis=-1, keepdims=True)                     # [B, 1]
    x_bow16 = jnp.pad(x_bow, ((0, 0), (0, V_pad - V))).astype(bf16)   # counts exact

    kernel = functools.partial(decoder_network_kernel, K,
                               float(kl_multiplier), V, tile_v, needs_mask)

    def full(shape):
        # whole-array block, resident for the entire grid (single DMA)
        return pl.BlockSpec(shape, lambda b, v: (0, 0))

    out = pl.pallas_call(
        kernel,
        out_shape=jax.ShapeDtypeStruct((1, nb * 128), jnp.float32),
        grid_spec=pltpu.PrefetchScalarGridSpec(
            num_scalar_prefetch=0,
            grid=(nb, nv),                               # (batch tile, vocab tile)
            in_specs=[
                pl.BlockSpec((TB, tile_v), lambda b, v: (b, v)),   # x_bow (bf16)
                pl.BlockSpec((TB, bert), lambda b, v: (b, 0)),     # x_bert
                pl.BlockSpec((TB, K), lambda b, v: (b, 0)),        # eps
                pl.BlockSpec((TB, 1), lambda b, v: (b, 0)),        # sum(bow)
                full((bert, 2 * h1)), full((1, 2 * h1)),           # w1, b1
                full((2 * h1, 2 * h2)), full((1, 2 * h2)),         # w2, b2
                full((2 * h2, 2 * K)), full((1, 2 * K)),           # w3, b3
                pl.BlockSpec((K, tile_v), lambda b, v: (0, v)),    # beta tile
                full((1, K)),                                      # beta row-sums
                full((K, K)),                                      # beta Gram
                full((1, K)),                                      # prior_mean
                full((1, K)),                                      # prior_variance
            ],
            out_specs=pl.BlockSpec((1, 128), lambda b, v: (0, b)),
            scratch_shapes=[
                pltpu.VMEM((TB, K), jnp.float32),   # policy
                pltpu.VMEM((TB, 1), jnp.float32),   # KL per row
                pltpu.VMEM((TB, 1), jnp.float32),   # LayerNorm mean
                pltpu.VMEM((TB, 1), jnp.float32),   # LayerNorm rstd
                pltpu.VMEM((TB, 1), jnp.float32),   # running max
                pltpu.VMEM((TB, 1), jnp.float32),   # running sum(exp)
                pltpu.VMEM((TB, 1), jnp.float32),   # running sum(bow * t)
            ]),
        compiler_params=pltpu.CompilerParams(
            dimension_semantics=("parallel", "arbitrary"),
            vmem_limit_bytes=_vmem_limit_bytes()),
    )(x_bow16, x_bert, eps, sbow, w1, b1, w2, b2, w3, b3,
      beta16, rowsum, gram, params["prior_mean"], params["prior_variance"])

    partial_sums = out.reshape(nb, 128)[:, 0]        # one partial per batch tile
    return jnp.sum(partial_sums) / float(B)          # reward.mean()


def init_params(key, input_size, bert_size, n_components, hidden_sizes):
    """Deterministic init matching DecoderNetwork._init_weights."""
    ks = jax.random.split(key, 7)

    def linear(k, fan_in, fan_out):
        w = 0.02 * jax.random.normal(k, (fan_in, fan_out), jnp.float32)
        b = jnp.zeros((1, fan_out), jnp.float32)
        return w, b

    h1, h2 = hidden_sizes
    w1m, b1m = linear(ks[0], bert_size, h1)
    w2m, b2m = linear(ks[1], h1, h2)
    w3m, b3m = linear(ks[2], h2, n_components)
    w1s, b1s = linear(ks[3], bert_size, h1)
    w2s, b2s = linear(ks[4], h1, h2)
    w3s, b3s = linear(ks[5], h2, n_components)
    beta = 0.02 * jax.random.normal(ks[6], (n_components, input_size),
                                    jnp.float32)
    prior_mean = jnp.zeros((1, n_components), jnp.float32)
    prior_variance = jnp.ones((1, n_components), jnp.float32)
    return dict(w1m=w1m, b1m=b1m, w2m=w2m, b2m=b2m, w3m=w3m, b3m=b3m,
                w1s=w1s, b1s=b1s, w2s=w2s, b2s=b2s, w3s=w3s, b3s=b3s,
                beta=beta, prior_mean=prior_mean,
                prior_variance=prior_variance)


if __name__ == "__main__":
    B = 16
    input_size = 1000       # vocab size (not a multiple of 128 -> pad+mask path)
    bert_size = 128         # BERT embedding dim (x_bert feature dim)
    n_components = 16       # number of topics
    hidden_sizes = (128, 128)
    kl_multiplier = 1.0

    key = jax.random.PRNGKey(0)
    k_params, k_bow, k_bert, k_eps = jax.random.split(key, 4)

    params = init_params(k_params, input_size, bert_size, n_components,
                         hidden_sizes)
    x_bow = jax.random.poisson(k_bow, 1.0, (B, input_size)).astype(jnp.float32)
    x_bert = jax.random.normal(k_bert, (B, bert_size), jnp.float32)
    eps = jax.random.normal(k_eps, (B, n_components), jnp.float32)

    loss = decoder_network_forward(params, x_bow, x_bert, eps,
                                   n_components, kl_multiplier,
                                   tile_v=256,   # 4 vocab tiles (last masked)
                                   tile_b=8)     # 2 batch tiles
    jax.block_until_ready(loss)
    print("KERNEL_OK")
</pallas_src>

<mosaic_0001>
module attributes {stable_mosaic.version = 11 : i64} {
  func.func @decoder_network_kernel(%arg0: i32, %arg1: i32, %arg2: memref<8x256xbf16, #tpu.memory_space<vmem>>, %arg3: memref<8x128xf32, #tpu.memory_space<vmem>>, %arg4: memref<8x16xf32, #tpu.memory_space<vmem>>, %arg5: memref<8x1xf32, #tpu.memory_space<vmem>>, %arg6: memref<128x256xbf16, #tpu.memory_space<vmem>>, %arg7: memref<1x256xf32, #tpu.memory_space<vmem>>, %arg8: memref<256x256xbf16, #tpu.memory_space<vmem>>, %arg9: memref<1x256xf32, #tpu.memory_space<vmem>>, %arg10: memref<256x32xbf16, #tpu.memory_space<vmem>>, %arg11: memref<1x32xf32, #tpu.memory_space<vmem>>, %arg12: memref<16x256xbf16, #tpu.memory_space<vmem>>, %arg13: memref<1x16xf32, #tpu.memory_space<vmem>>, %arg14: memref<16x16xf32, #tpu.memory_space<vmem>>, %arg15: memref<1x16xf32, #tpu.memory_space<vmem>>, %arg16: memref<1x16xf32, #tpu.memory_space<vmem>>, %arg17: memref<1x128xf32, #tpu.memory_space<vmem>>, %arg18: memref<8x16xf32, #tpu.memory_space<vmem>>, %arg19: memref<8x1xf32, #tpu.memory_space<vmem>>, %arg20: memref<8x1xf32, #tpu.memory_space<vmem>>, %arg21: memref<8x1xf32, #tpu.memory_space<vmem>>, %arg22: memref<8x1xf32, #tpu.memory_space<vmem>>, %arg23: memref<8x1xf32, #tpu.memory_space<vmem>>, %arg24: memref<8x1xf32, #tpu.memory_space<vmem>>) attributes {dimension_semantics = [#tpu.dimension_semantics<parallel>, #tpu.dimension_semantics<arbitrary>], iteration_bounds = array<i64: 2, 4>, scalar_prefetch = 0 : i64, scratch_operands = 7 : i64, tpu.core_type = #tpu.core_type<tc>, window_params = [{transform_indices = @transform_0, window_bounds = array<i64: 8, 256>}, {transform_indices = @transform_1, window_bounds = array<i64: 8, 128>}, {transform_indices = @transform_2, window_bounds = array<i64: 8, 16>}, {transform_indices = @transform_3, window_bounds = array<i64: 8, 1>}, {pipeline_mode = #tpu.pipeline_mode<synchronous>, transform_indices = @transform_4, window_bounds = array<i64: 128, 256>}, {pipeline_mode = #tpu.pipeline_mode<synchronous>, transform_indices = @transform_5, window_bounds = array<i64: 1, 256>}, {pipeline_mode = #tpu.pipeline_mode<synchronous>, transform_indices = @transform_6, window_bounds = array<i64: 256, 256>}, {pipeline_mode = #tpu.pipeline_mode<synchronous>, transform_indices = @transform_7, window_bounds = array<i64: 1, 256>}, {pipeline_mode = #tpu.pipeline_mode<synchronous>, transform_indices = @transform_8, window_bounds = array<i64: 256, 32>}, {pipeline_mode = #tpu.pipeline_mode<synchronous>, transform_indices = @transform_9, window_bounds = array<i64: 1, 32>}, {transform_indices = @transform_10, window_bounds = array<i64: 16, 256>}, {pipeline_mode = #tpu.pipeline_mode<synchronous>, transform_indices = @transform_11, window_bounds = array<i64: 1, 16>}, {pipeline_mode = #tpu.pipeline_mode<synchronous>, transform_indices = @transform_12, window_bounds = array<i64: 16, 16>}, {pipeline_mode = #tpu.pipeline_mode<synchronous>, transform_indices = @transform_13, window_bounds = array<i64: 1, 16>}, {pipeline_mode = #tpu.pipeline_mode<synchronous>, transform_indices = @transform_14, window_bounds = array<i64: 1, 16>}, {transform_indices = @transform_15, window_bounds = array<i64: 1, 128>}]} {
    %c0_i32 = arith.constant 0 : i32
    %0 = arith.cmpi eq, %arg1, %c0_i32 : i32
    %1 = arith.extui %0 : i1 to i32
    %c0_i32_0 = arith.constant 0 : i32
    %2 = arith.cmpi ne, %1, %c0_i32_0 : i32
    scf.if %2 {
      %c0_29 = arith.constant 0 : index
      %c0_30 = arith.constant 0 : index
      %51 = vector.load %arg3[%c0_29, %c0_30] : memref<8x128xf32, #tpu.memory_space<vmem>>, vector<8x128xf32>
      %52 = arith.truncf %51 : vector<8x128xf32> to vector<8x128xbf16>
      %c0_31 = arith.constant 0 : index
      %c0_32 = arith.constant 0 : index
      %53 = vector.load %arg6[%c0_31, %c0_32] : memref<128x256xbf16, #tpu.memory_space<vmem>>, vector<128x256xbf16>
      %cst_33 = arith.constant dense<0.000000e+00> : vector<8x256xf32>
      %54 = tpu.matmul %52, %53, %cst_33 {dimension_numbers = #tpu.dot_dimension_numbers<[1], [0], [0], [1], [0, 0, 1, 1], [], []>} : vector<8x128xbf16>, vector<128x256xbf16>, vector<8x256xf32> -> vector<8x256xf32>
      %c0_34 = arith.constant 0 : index
      %c0_35 = arith.constant 0 : index
      %55 = vector.load %arg7[%c0_34, %c0_35] : memref<1x256xf32, #tpu.memory_space<vmem>>, vector<1x256xf32>
      %56 = vector.broadcast %55 : vector<1x256xf32> to vector<8x256xf32>
      %57 = arith.addf %54, %56 : vector<8x256xf32>
      %cst_36 = arith.constant 5.000000e-01 : f32
      %58 = vector.broadcast %cst_36 : f32 to vector<8x256xf32>
      %59 = arith.mulf %58, %57 : vector<8x256xf32>
      %cst_37 = arith.constant 0.707106769 : f32
      %60 = vector.broadcast %cst_37 : f32 to vector<8x256xf32>
      %61 = arith.mulf %57, %60 : vector<8x256xf32>
      %62 = math.erf %61 : vector<8x256xf32>
      %cst_38 = arith.constant 1.000000e+00 : f32
      %63 = vector.broadcast %cst_38 : f32 to vector<8x256xf32>
      %64 = arith.addf %63, %62 : vector<8x256xf32>
      %65 = arith.mulf %59, %64 : vector<8x256xf32>
      %66 = arith.truncf %65 : vector<8x256xf32> to vector<8x256xbf16>
      %c0_39 = arith.constant 0 : index
      %c0_40 = arith.constant 0 : index
      %67 = vector.load %arg8[%c0_39, %c0_40] : memref<256x256xbf16, #tpu.memory_space<vmem>>, vector<256x256xbf16>
      %cst_41 = arith.constant dense<0.000000e+00> : vector<8x256xf32>
      %68 = tpu.matmul %66, %67, %cst_41 {dimension_numbers = #tpu.dot_dimension_numbers<[1], [0], [0], [1], [0, 0, 1, 1], [], []>} : vector<8x256xbf16>, vector<256x256xbf16>, vector<8x256xf32> -> vector<8x256xf32>
      %c0_42 = arith.constant 0 : index
      %c0_43 = arith.constant 0 : index
      %69 = vector.load %arg9[%c0_42, %c0_43] : memref<1x256xf32, #tpu.memory_space<vmem>>, vector<1x256xf32>
      %70 = vector.broadcast %69 : vector<1x256xf32> to vector<8x256xf32>
      %71 = arith.addf %68, %70 : vector<8x256xf32>
      %cst_44 = arith.constant 5.000000e-01 : f32
      %72 = vector.broadcast %cst_44 : f32 to vector<8x256xf32>
      %73 = arith.mulf %72, %71 : vector<8x256xf32>
      %cst_45 = arith.constant 0.707106769 : f32
      %74 = vector.broadcast %cst_45 : f32 to vector<8x256xf32>
      %75 = arith.mulf %71, %74 : vector<8x256xf32>
      %76 = math.erf %75 : vector<8x256xf32>
      %cst_46 = arith.constant 1.000000e+00 : f32
      %77 = vector.broadcast %cst_46 : f32 to vector<8x256xf32>
      %78 = arith.addf %77, %76 : vector<8x256xf32>
      %79 = arith.mulf %73, %78 : vector<8x256xf32>
      %80 = arith.truncf %79 : vector<8x256xf32> to vector<8x256xbf16>
      %c0_47 = arith.constant 0 : index
      %c0_48 = arith.constant 0 : index
      %81 = vector.load %arg10[%c0_47, %c0_48] : memref<256x32xbf16, #tpu.memory_space<vmem>>, vector<256x32xbf16>
      %cst_49 = arith.constant dense<0.000000e+00> : vector<8x32xf32>
      %82 = tpu.matmul %80, %81, %cst_49 {dimension_numbers = #tpu.dot_dimension_numbers<[1], [0], [0], [1], [0, 0, 1, 1], [], []>} : vector<8x256xbf16>, vector<256x32xbf16>, vector<8x32xf32> -> vector<8x32xf32>
      %c0_50 = arith.constant 0 : index
      %c0_51 = arith.constant 0 : index
      %83 = vector.load %arg11[%c0_50, %c0_51] : memref<1x32xf32, #tpu.memory_space<vmem>>, vector<1x32xf32>
      %84 = vector.broadcast %83 : vector<1x32xf32> to vector<8x32xf32>
      %85 = arith.addf %82, %84 : vector<8x32xf32>
      %86 = vector.extract_strided_slice %85 {offsets = [0, 0], sizes = [8, 16], strides = [1, 1]} : vector<8x32xf32> to vector<8x16xf32>
      %87 = vector.extract_strided_slice %85 {offsets = [0, 16], sizes = [8, 16], strides = [1, 1]} : vector<8x32xf32> to vector<8x16xf32>
      %cst_52 = arith.constant dense<0.000000e+00> : vector<8xf32>
      %88 = vector.multi_reduction <add>, %87, %cst_52 [1] : vector<8x16xf32> to vector<8xf32>
      %89 = vector.shape_cast %88 : vector<8xf32> to vector<8x1xf32>
      %cst_53 = arith.constant 1.600000e+01 : f32
      %90 = vector.broadcast %cst_53 : f32 to vector<8x1xf32>
      %91 = arith.divf %89, %90 : vector<8x1xf32>
      %92 = vector.broadcast %91 : vector<8x1xf32> to vector<8x16xf32>
      %93 = arith.subf %87, %92 : vector<8x16xf32>
      %94 = arith.mulf %93, %93 : vector<8x16xf32>
      %cst_54 = arith.constant dense<0.000000e+00> : vector<8xf32>
      %95 = vector.multi_reduction <add>, %94, %cst_54 [1] : vector<8x16xf32> to vector<8xf32>
      %96 = vector.shape_cast %95 : vector<8xf32> to vector<8x1xf32>
      %cst_55 = arith.constant 1.600000e+01 : f32
      %97 = vector.broadcast %cst_55 : f32 to vector<8x1xf32>
      %98 = arith.divf %96, %97 : vector<8x1xf32>
      %99 = vector.broadcast %91 : vector<8x1xf32> to vector<8x16xf32>
      %100 = arith.subf %87, %99 : vector<8x16xf32>
      %cst_56 = arith.constant 9.99999974E-6 : f32
      %101 = vector.broadcast %cst_56 : f32 to vector<8x1xf32>
      %102 = arith.addf %98, %101 : vector<8x1xf32>
      %103 = math.rsqrt %102 : vector<8x1xf32>
      %104 = vector.broadcast %103 : vector<8x1xf32> to vector<8x16xf32>
      %105 = arith.mulf %100, %104 : vector<8x16xf32>
      %c0_57 = arith.constant 0 : index
      %c0_58 = arith.constant 0 : index
      %106 = vector.load %arg4[%c0_57, %c0_58] : memref<8x16xf32, #tpu.memory_space<vmem>>, vector<8x16xf32>
      %cst_59 = arith.constant -5.000000e-01 : f32
      %107 = vector.broadcast %cst_59 : f32 to vector<8x16xf32>
      %108 = arith.mulf %107, %106 : vector<8x16xf32>
      %109 = arith.mulf %108, %106 : vector<8x16xf32>
      %110 = arith.subf %109, %105 : vector<8x16xf32>
      %111 = math.exp %110 : vector<8x16xf32>
      %cst_60 = arith.constant 0.398942292 : f32
      %112 = vector.broadcast %cst_60 : f32 to vector<8x16xf32>
      %113 = arith.mulf %112, %111 : vector<8x16xf32>
      %c0_61 = arith.constant 0 : index
      %c0_62 = arith.constant 0 : index
      %114 = vector.load %arg18[%c0_61, %c0_62] : memref<8x16xf32, #tpu.memory_space<vmem>>, vector<8x16xf32>
      tpu.vector_store %arg18[%c0_61, %c0_62], %113 {strides = array<i32>} : memref<8x16xf32, #tpu.memory_space<vmem>>, vector<8x16xf32>,
      %c0_63 = arith.constant 0 : index
      %c0_64 = arith.constant 0 : index
      %115 = vector.load %arg15[%c0_63, %c0_64] : memref<1x16xf32, #tpu.memory_space<vmem>>, vector<1x16xf32>
      %c0_65 = arith.constant 0 : index
      %c0_66 = arith.constant 0 : index
      %116 = vector.load %arg16[%c0_65, %c0_66] : memref<1x16xf32, #tpu.memory_space<vmem>>, vector<1x16xf32>
      %117 = arith.mulf %116, %116 : vector<1x16xf32>
      %cst_67 = arith.constant 1.000000e+00 : f32
      %118 = vector.broadcast %cst_67 : f32 to vector<1x16xf32>
      %119 = arith.divf %118, %117 : vector<1x16xf32>
      %cst_68 = arith.constant 2.000000e+00 : f32
      %120 = vector.broadcast %cst_68 : f32 to vector<8x16xf32>
      %121 = arith.mulf %120, %105 : vector<8x16xf32>
      %122 = math.exp %121 : vector<8x16xf32>
      %123 = vector.broadcast %119 : vector<1x16xf32> to vector<8x16xf32>
      %124 = arith.mulf %122, %123 : vector<8x16xf32>
      %cst_69 = arith.constant dense<0.000000e+00> : vector<8xf32>
      %125 = vector.multi_reduction <add>, %124, %cst_69 [1] : vector<8x16xf32> to vector<8xf32>
      %126 = vector.shape_cast %125 : vector<8xf32> to vector<8x1xf32>
      %127 = vector.broadcast %115 : vector<1x16xf32> to vector<8x16xf32>
      %128 = arith.subf %127, %86 : vector<8x16xf32>
      %129 = arith.mulf %128, %128 : vector<8x16xf32>
      %130 = vector.broadcast %119 : vector<1x16xf32> to vector<8x16xf32>
      %131 = arith.mulf %129, %130 : vector<8x16xf32>
      %cst_70 = arith.constant dense<0.000000e+00> : vector<8xf32>
      %132 = vector.multi_reduction <add>, %131, %cst_70 [1] : vector<8x16xf32> to vector<8xf32>
      %133 = vector.shape_cast %132 : vector<8xf32> to vector<8x1xf32>
      %134 = math.log %117 : vector<1x16xf32>
      %cst_71 = arith.constant 2.000000e+00 : f32
      %135 = vector.broadcast %cst_71 : f32 to vector<8x16xf32>
      %136 = arith.mulf %135, %105 : vector<8x16xf32>
      %137 = vector.broadcast %134 : vector<1x16xf32> to vector<8x16xf32>
      %138 = arith.subf %137, %136 : vector<8x16xf32>
      %cst_72 = arith.constant dense<0.000000e+00> : vector<8xf32>
      %139 = vector.multi_reduction <add>, %138, %cst_72 [1] : vector<8x16xf32> to vector<8xf32>
      %140 = vector.shape_cast %139 : vector<8xf32> to vector<8x1xf32>
      %141 = arith.addf %126, %133 : vector<8x1xf32>
      %cst_73 = arith.constant 1.600000e+01 : f32
      %142 = vector.broadcast %cst_73 : f32 to vector<8x1xf32>
      %143 = arith.subf %141, %142 : vector<8x1xf32>
      %144 = arith.addf %143, %140 : vector<8x1xf32>
      %cst_74 = arith.constant 5.000000e-01 : f32
      %145 = vector.broadcast %cst_74 : f32 to vector<8x1xf32>
      %146 = arith.mulf %145, %144 : vector<8x1xf32>
      %c0_75 = arith.constant 0 : index
      %c0_76 = arith.constant 0 : index
      %147 = vector.load %arg19[%c0_75, %c0_76] : memref<8x1xf32, #tpu.memory_space<vmem>>, vector<8x1xf32>
      tpu.vector_store %arg19[%c0_75, %c0_76], %146 {strides = array<i32>} : memref<8x1xf32, #tpu.memory_space<vmem>>, vector<8x1xf32>,
      %c0_77 = arith.constant 0 : index
      %c0_78 = arith.constant 0 : index
      %148 = vector.load %arg13[%c0_77, %c0_78] : memref<1x16xf32, #tpu.memory_space<vmem>>, vector<1x16xf32>
      %149 = vector.broadcast %148 : vector<1x16xf32> to vector<8x16xf32>
      %150 = arith.mulf %113, %149 : vector<8x16xf32>
      %cst_79 = arith.constant dense<0.000000e+00> : vector<8xf32>
      %151 = vector.multi_reduction <add>, %150, %cst_79 [1] : vector<8x16xf32> to vector<8xf32>
      %152 = vector.shape_cast %151 : vector<8xf32> to vector<8x1xf32>
      %c0_80 = arith.constant 0 : index
      %c0_81 = arith.constant 0 : index
      %153 = vector.load %arg14[%c0_80, %c0_81] : memref<16x16xf32, #tpu.memory_space<vmem>>, vector<16x16xf32>
      %cst_82 = arith.constant dense<0.000000e+00> : vector<8x16xf32>
      %154 = tpu.matmul %113, %153, %cst_82 {dimension_numbers = #tpu.dot_dimension_numbers<[1], [0], [0], [1], [0, 0, 1, 1], [], []>} : vector<8x16xf32>, vector<16x16xf32>, vector<8x16xf32> -> vector<8x16xf32>
      %155 = arith.mulf %154, %113 : vector<8x16xf32>
      %cst_83 = arith.constant dense<0.000000e+00> : vector<8xf32>
      %156 = vector.multi_reduction <add>, %155, %cst_83 [1] : vector<8x16xf32> to vector<8xf32>
      %157 = vector.shape_cast %156 : vector<8xf32> to vector<8x1xf32>
      %cst_84 = arith.constant 1.000000e-03 : f32
      %158 = vector.broadcast %cst_84 : f32 to vector<8x1xf32>
      %159 = arith.mulf %152, %158 : vector<8x1xf32>
      %cst_85 = arith.constant 1.000000e-03 : f32
      %160 = vector.broadcast %cst_85 : f32 to vector<8x1xf32>
      %161 = arith.mulf %157, %160 : vector<8x1xf32>
      %162 = arith.mulf %159, %159 : vector<8x1xf32>
      %163 = arith.subf %161, %162 : vector<8x1xf32>
      %c0_86 = arith.constant 0 : index
      %c0_87 = arith.constant 0 : index
      %164 = vector.load %arg20[%c0_86, %c0_87] : memref<8x1xf32, #tpu.memory_space<vmem>>, vector<8x1xf32>
      tpu.vector_store %arg20[%c0_86, %c0_87], %159 {strides = array<i32>} : memref<8x1xf32, #tpu.memory_space<vmem>>, vector<8x1xf32>,
      %cst_88 = arith.constant 9.99999974E-6 : f32
      %165 = vector.broadcast %cst_88 : f32 to vector<8x1xf32>
      %166 = arith.addf %163, %165 : vector<8x1xf32>
      %167 = math.rsqrt %166 : vector<8x1xf32>
      %c0_89 = arith.constant 0 : index
      %c0_90 = arith.constant 0 : index
      %168 = vector.load %arg21[%c0_89, %c0_90] : memref<8x1xf32, #tpu.memory_space<vmem>>, vector<8x1xf32>
      tpu.vector_store %arg21[%c0_89, %c0_90], %167 {strides = array<i32>} : memref<8x1xf32, #tpu.memory_space<vmem>>, vector<8x1xf32>,
      %cst_91 = arith.constant 0xFF800000 : f32
      %169 = vector.broadcast %cst_91 : f32 to vector<8x1xf32>
      %c0_92 = arith.constant 0 : index
      %c0_93 = arith.constant 0 : index
      %170 = vector.load %arg22[%c0_92, %c0_93] : memref<8x1xf32, #tpu.memory_space<vmem>>, vector<8x1xf32>
      tpu.vector_store %arg22[%c0_92, %c0_93], %169 {strides = array<i32>} : memref<8x1xf32, #tpu.memory_space<vmem>>, vector<8x1xf32>,
      %cst_94 = arith.constant 0.000000e+00 : f32
      %171 = vector.broadcast %cst_94 : f32 to vector<8x1xf32>
      %c0_95 = arith.constant 0 : index
      %c0_96 = arith.constant 0 : index
      %172 = vector.load %arg23[%c0_95, %c0_96] : memref<8x1xf32, #tpu.memory_space<vmem>>, vector<8x1xf32>
      tpu.vector_store %arg23[%c0_95, %c0_96], %171 {strides = array<i32>} : memref<8x1xf32, #tpu.memory_space<vmem>>, vector<8x1xf32>,
      %cst_97 = arith.constant 0.000000e+00 : f32
      %173 = vector.broadcast %cst_97 : f32 to vector<8x1xf32>
      %c0_98 = arith.constant 0 : index
      %c0_99 = arith.constant 0 : index
      %174 = vector.load %arg24[%c0_98, %c0_99] : memref<8x1xf32, #tpu.memory_space<vmem>>, vector<8x1xf32>
      tpu.vector_store %arg24[%c0_98, %c0_99], %173 {strides = array<i32>} : memref<8x1xf32, #tpu.memory_space<vmem>>, vector<8x1xf32>,
    } else {
    }
    %c0 = arith.constant 0 : index
    %c0_1 = arith.constant 0 : index
    %3 = vector.load %arg18[%c0, %c0_1] : memref<8x16xf32, #tpu.memory_space<vmem>>, vector<8x16xf32>
    %4 = arith.truncf %3 : vector<8x16xf32> to vector<8x16xbf16>
    %c0_2 = arith.constant 0 : index
    %c0_3 = arith.constant 0 : index
    %5 = vector.load %arg12[%c0_2, %c0_3] : memref<16x256xbf16, #tpu.memory_space<vmem>>, vector<16x256xbf16>
    %cst = arith.constant dense<0.000000e+00> : vector<8x256xf32>
    %6 = tpu.matmul %4, %5, %cst {dimension_numbers = #tpu.dot_dimension_numbers<[1], [0], [0], [1], [0, 0, 1, 1], [], []>} : vector<8x16xbf16>, vector<16x256xbf16>, vector<8x256xf32> -> vector<8x256xf32>
    %c0_4 = arith.constant 0 : index
    %c0_5 = arith.constant 0 : index
    %7 = vector.load %arg20[%c0_4, %c0_5] : memref<8x1xf32, #tpu.memory_space<vmem>>, vector<8x1xf32>
    %8 = vector.broadcast %7 : vector<8x1xf32> to vector<8x256xf32>
    %9 = arith.subf %6, %8 : vector<8x256xf32>
    %c0_6 = arith.constant 0 : index
    %c0_7 = arith.constant 0 : index
    %10 = vector.load %arg21[%c0_6, %c0_7] : memref<8x1xf32, #tpu.memory_space<vmem>>, vector<8x1xf32>
    %11 = vector.broadcast %10 : vector<8x1xf32> to vector<8x256xf32>
    %12 = arith.mulf %9, %11 : vector<8x256xf32>
    %c256_i32 = arith.constant 256 : i32
    %13 = arith.muli %arg1, %c256_i32 : i32
    %14 = tpu.iota {dimensions = array<i32: 1>} : vector<1x256xi32>
    %15 = vector.broadcast %13 : i32 to vector<1x256xi32>
    %16 = arith.addi %15, %14 : vector<1x256xi32>
    %c1000_i32 = arith.constant 1000 : i32
    %17 = vector.broadcast %c1000_i32 : i32 to vector<1x256xi32>
    %18 = arith.cmpi slt, %16, %17 : vector<1x256xi32>
    %cst_8 = arith.constant 0xFF800000 : f32
    %19 = vector.shape_cast %18 : vector<1x256xi1> to vector<1x256xi1>
    %20 = vector.broadcast %19 : vector<1x256xi1> to vector<8x256xi1>
    %21 = vector.broadcast %cst_8 : f32 to vector<8x256xf32>
    %22 = arith.select %20, %12, %21 : vector<8x256xi1>, vector<8x256xf32>
    %c0_9 = arith.constant 0 : index
    %c0_10 = arith.constant 0 : index
    %23 = vector.load %arg22[%c0_9, %c0_10] : memref<8x1xf32, #tpu.memory_space<vmem>>, vector<8x1xf32>
    %cst_11 = arith.constant dense<0xFF800000> : vector<8xf32>
    %24 = vector.multi_reduction <maximumf>, %22, %cst_11 [1] : vector<8x256xf32> to vector<8xf32>
    %25 = vector.shape_cast %24 : vector<8xf32> to vector<8x1xf32>
    %26 = arith.maximumf %23, %25 : vector<8x1xf32>
    %c0_12 = arith.constant 0 : index
    %c0_13 = arith.constant 0 : index
    %27 = vector.load %arg23[%c0_12, %c0_13] : memref<8x1xf32, #tpu.memory_space<vmem>>, vector<8x1xf32>
    %c0_14 = arith.constant 0 : index
    %c0_15 = arith.constant 0 : index
    %28 = vector.load %arg22[%c0_14, %c0_15] : memref<8x1xf32, #tpu.memory_space<vmem>>, vector<8x1xf32>
    %29 = arith.subf %28, %26 : vector<8x1xf32>
    %30 = math.exp %29 : vector<8x1xf32>
    %31 = arith.mulf %27, %30 : vector<8x1xf32>
    %32 = vector.broadcast %26 : vector<8x1xf32> to vector<8x256xf32>
    %33 = arith.subf %22, %32 : vector<8x256xf32>
    %34 = math.exp %33 : vector<8x256xf32>
    %cst_16 = arith.constant dense<0.000000e+00> : vector<8xf32>
    %35 = vector.multi_reduction <add>, %34, %cst_16 [1] : vector<8x256xf32> to vector<8xf32>
    %36 = vector.shape_cast %35 : vector<8xf32> to vector<8x1xf32>
    %37 = arith.addf %31, %36 : vector<8x1xf32>
    %c0_17 = arith.constant 0 : index
    %c0_18 = arith.constant 0 : index
    %38 = vector.load %arg23[%c0_17, %c0_18] : memref<8x1xf32, #tpu.memory_space<vmem>>, vector<8x1xf32>
    tpu.vector_store %arg23[%c0_17, %c0_18], %37 {strides = array<i32>} : memref<8x1xf32, #tpu.memory_space<vmem>>, vector<8x1xf32>,
    %c0_19 = arith.constant 0 : index
    %c0_20 = arith.constant 0 : index
    %39 = vector.load %arg2[%c0_19, %c0_20] : memref<8x256xbf16, #tpu.memory_space<vmem>>, vector<8x256xbf16>
    %40 = arith.extf %39 : vector<8x256xbf16> to vector<8x256xf32>
    %c0_21 = arith.constant 0 : index
    %c0_22 = arith.constant 0 : index
    %41 = vector.load %arg24[%c0_21, %c0_22] : memref<8x1xf32, #tpu.memory_space<vmem>>, vector<8x1xf32>
    %42 = arith.mulf %40, %12 : vector<8x256xf32>
    %cst_23 = arith.constant dense<0.000000e+00> : vector<8xf32>
    %43 = vector.multi_reduction <add>, %42, %cst_23 [1] : vector<8x256xf32> to vector<8xf32>
    %44 = vector.shape_cast %43 : vector<8xf32> to vector<8x1xf32>
    %45 = arith.addf %41, %44 : vector<8x1xf32>
    %c0_24 = arith.constant 0 : index
    %c0_25 = arith.constant 0 : index
    %46 = vector.load %arg24[%c0_24, %c0_25] : memref<8x1xf32, #tpu.memory_space<vmem>>, vector<8x1xf32>
    tpu.vector_store %arg24[%c0_24, %c0_25], %45 {strides = array<i32>} : memref<8x1xf32, #tpu.memory_space<vmem>>, vector<8x1xf32>,
    %c0_26 = arith.constant 0 : index
    %c0_27 = arith.constant 0 : index
    %47 = vector.load %arg22[%c0_26, %c0_27] : memref<8x1xf32, #tpu.memory_space<vmem>>, vector<8x1xf32>
    tpu.vector_store %arg22[%c0_26, %c0_27], %26 {strides = array<i32>} : memref<8x1xf32, #tpu.memory_space<vmem>>, vector<8x1xf32>,
    %c3_i32 = arith.constant 3 : i32
    %48 = arith.cmpi eq, %arg1, %c3_i32 : i32
    %49 = arith.extui %48 : i1 to i32
    %c0_i32_28 = arith.constant 0 : i32
    %50 = arith.cmpi ne, %49, %c0_i32_28 : i32
    scf.if %50 {
      %c0_29 = arith.constant 0 : index
      %c0_30 = arith.constant 0 : index
      %51 = vector.load %arg22[%c0_29, %c0_30] : memref<8x1xf32, #tpu.memory_space<vmem>>, vector<8x1xf32>
      %c0_31 = arith.constant 0 : index
      %c0_32 = arith.constant 0 : index
      %52 = vector.load %arg23[%c0_31, %c0_32] : memref<8x1xf32, #tpu.memory_space<vmem>>, vector<8x1xf32>
      %53 = math.log %52 : vector<8x1xf32>
      %54 = arith.addf %51, %53 : vector<8x1xf32>
      %c0_33 = arith.constant 0 : index
      %c0_34 = arith.constant 0 : index
      %55 = vector.load %arg5[%c0_33, %c0_34] : memref<8x1xf32, #tpu.memory_space<vmem>>, vector<8x1xf32>
      %56 = arith.mulf %54, %55 : vector<8x1xf32>
      %c0_35 = arith.constant 0 : index
      %c0_36 = arith.constant 0 : index
      %57 = vector.load %arg24[%c0_35, %c0_36] : memref<8x1xf32, #tpu.memory_space<vmem>>, vector<8x1xf32>
      %58 = arith.subf %56, %57 : vector<8x1xf32>
      %c0_37 = arith.constant 0 : index
      %c0_38 = arith.constant 0 : index
      %59 = vector.load %arg19[%c0_37, %c0_38] : memref<8x1xf32, #tpu.memory_space<vmem>>, vector<8x1xf32>
      %cst_39 = arith.constant 1.000000e+00 : f32
      %60 = vector.broadcast %cst_39 : f32 to vector<8x1xf32>
      %61 = arith.mulf %60, %59 : vector<8x1xf32>
      %62 = arith.addf %58, %61 : vector<8x1xf32>
      %cst_40 = arith.constant dense<0.000000e+00> : vector<1xf32>
      %63 = vector.multi_reduction <add>, %62, %cst_40 [0] : vector<8x1xf32> to vector<1xf32>
      %64 = vector.shape_cast %63 : vector<1xf32> to vector<1x1xf32>
      %65 = vector.shape_cast %64 : vector<1x1xf32> to vector<1x1xf32>
      %66 = vector.broadcast %65 : vector<1x1xf32> to vector<1x128xf32>
      %c0_41 = arith.constant 0 : index
      %c0_42 = arith.constant 0 : index
      %67 = vector.load %arg17[%c0_41, %c0_42] : memref<1x128xf32, #tpu.memory_space<vmem>>, vector<1x128xf32>
      tpu.vector_store %arg17[%c0_41, %c0_42], %66 {strides = array<i32>} : memref<1x128xf32, #tpu.memory_space<vmem>>, vector<1x128xf32>,
    } else {
    }
    return
  }
  func.func @transform_0(%arg0: i32, %arg1: i32) -> (i32, i32) {
    %c0_i32 = arith.constant 0 : i32
    return %arg0, %arg1 : i32, i32
  }
  func.func @transform_1(%arg0: i32, %arg1: i32) -> (i32, i32) {
    %c0_i32 = arith.constant 0 : i32
    %c0_i32_0 = arith.constant 0 : i32
    return %arg0, %c0_i32 : i32, i32
  }
  func.func @transform_2(%arg0: i32, %arg1: i32) -> (i32, i32) {
    %c0_i32 = arith.constant 0 : i32
    %c0_i32_0 = arith.constant 0 : i32
    return %arg0, %c0_i32 : i32, i32
  }
  func.func @transform_3(%arg0: i32, %arg1: i32) -> (i32, i32) {
    %c0_i32 = arith.constant 0 : i32
    %c0_i32_0 = arith.constant 0 : i32
    return %arg0, %c0_i32 : i32, i32
  }
  func.func @transform_4(%arg0: i32, %arg1: i32) -> (i32, i32) {
    %c0_i32 = arith.constant 0 : i32
    %c0_i32_0 = arith.constant 0 : i32
    %c0_i32_1 = arith.constant 0 : i32
    return %c0_i32, %c0_i32_0 : i32, i32
  }
  func.func @transform_5(%arg0: i32, %arg1: i32) -> (i32, i32) {
    %c0_i32 = arith.constant 0 : i32
    %c0_i32_0 = arith.constant 0 : i32
    %c0_i32_1 = arith.constant 0 : i32
    return %c0_i32, %c0_i32_0 : i32, i32
  }
  func.func @transform_6(%arg0: i32, %arg1: i32) -> (i32, i32) {
    %c0_i32 = arith.constant 0 : i32
    %c0_i32_0 = arith.constant 0 : i32
    %c0_i32_1 = arith.constant 0 : i32
    return %c0_i32, %c0_i32_0 : i32, i32
  }
  func.func @transform_7(%arg0: i32, %arg1: i32) -> (i32, i32) {
    %c0_i32 = arith.constant 0 : i32
    %c0_i32_0 = arith.constant 0 : i32
    %c0_i32_1 = arith.constant 0 : i32
    return %c0_i32, %c0_i32_0 : i32, i32
  }
  func.func @transform_8(%arg0: i32, %arg1: i32) -> (i32, i32) {
    %c0_i32 = arith.constant 0 : i32
    %c0_i32_0 = arith.constant 0 : i32
    %c0_i32_1 = arith.constant 0 : i32
    return %c0_i32, %c0_i32_0 : i32, i32
  }
  func.func @transform_9(%arg0: i32, %arg1: i32) -> (i32, i32) {
    %c0_i32 = arith.constant 0 : i32
    %c0_i32_0 = arith.constant 0 : i32
    %c0_i32_1 = arith.constant 0 : i32
    return %c0_i32, %c0_i32_0 : i32, i32
  }
  func.func @transform_10(%arg0: i32, %arg1: i32) -> (i32, i32) {
    %c0_i32 = arith.constant 0 : i32
    %c0_i32_0 = arith.constant 0 : i32
    return %c0_i32, %arg1 : i32, i32
  }
  func.func @transform_11(%arg0: i32, %arg1: i32) -> (i32, i32) {
    %c0_i32 = arith.constant 0 : i32
    %c0_i32_0 = arith.constant 0 : i32
    %c0_i32_1 = arith.constant 0 : i32
    return %c0_i32, %c0_i32_0 : i32, i32
  }
  func.func @transform_12(%arg0: i32, %arg1: i32) -> (i32, i32) {
    %c0_i32 = arith.constant 0 : i32
    %c0_i32_0 = arith.constant 0 : i32
    %c0_i32_1 = arith.constant 0 : i32
    return %c0_i32, %c0_i32_0 : i32, i32
  }
  func.func @transform_13(%arg0: i32, %arg1: i32) -> (i32, i32) {
    %c0_i32 = arith.constant 0 : i32
    %c0_i32_0 = arith.constant 0 : i32
    %c0_i32_1 = arith.constant 0 : i32
    return %c0_i32, %c0_i32_0 : i32, i32
  }
  func.func @transform_14(%arg0: i32, %arg1: i32) -> (i32, i32) {
    %c0_i32 = arith.constant 0 : i32
    %c0_i32_0 = arith.constant 0 : i32
    %c0_i32_1 = arith.constant 0 : i32
    return %c0_i32, %c0_i32_0 : i32, i32
  }
  func.func @transform_15(%arg0: i32, %arg1: i32) -> (i32, i32) {
    %c0_i32 = arith.constant 0 : i32
    %c0_i32_0 = arith.constant 0 : i32
    return %c0_i32, %arg0 : i32, i32
  }
}

</mosaic_0001>

<bundles_post_ra>
// kernel: tpu_custom_call.1
= control target key start
LH: loop header
LB: loop body
LE: loop exit
PB: predicated region body
PF: predicated region fallthrough
CT: control target
= control target key end

     0   :  { %s3199_s0 = inlined_call_operand.vmem [shape: bf16[16,1024], index: 0, kind: input, shape index: {}]   ;;  %s3200_s1 = inlined_call_operand.hbm [shape: f32[16,128], index: 1, kind: input, shape index: {}]   ;;  %s3201_s2 = inlined_call_operand.hbm [shape: f32[16,16], index: 2, kind: input, shape index: {}]   ;;  %s3202_s3 = inlined_call_operand.vmem [shape: f32[16,1], index: 3, kind: input, shape index: {}]   ;;  %s3203_s4 = inlined_call_operand.vmem [shape: bf16[128,256], index: 4, kind: input, shape index: {}]   ;;  %s3204_s5 = inlined_call_operand.vmem [shape: f32[1,256], index: 5, kind: input, shape index: {}]   ;;  %s3205_s6 = inlined_call_operand.hbm [shape: bf16[256,256], index: 6, kind: input, shape index: {}]   ;;  %s3206_s7 = inlined_call_operand.hbm [shape: f32[1,256], index: 7, kind: input, shape index: {}]   ;;  %s3207_s8 = inlined_call_operand.vmem [shape: bf16[256,32], index: 8, kind: input, shape index: {}]   ;;  %s3208_s9 = inlined_call_operand.vmem [shape: f32[1,32], index: 9, kind: input, shape index: {}]   ;;  %s3209_s10 = inlined_call_operand.hbm [shape: bf16[16,1024], index: 10, kind: input, shape index: {}]   ;;  %s3210_s11 = inlined_call_operand.vmem [shape: f32[1,16], index: 11, kind: input, shape index: {}]   ;;  %s3211_s12 = inlined_call_operand.vmem [shape: f32[16,16], index: 12, kind: input, shape index: {}]   ;;  %s3212_s13 = inlined_call_operand.vmem [shape: f32[1,16], index: 13, kind: input, shape index: {}]   ;;  %s3213_s14 = inlined_call_operand.vmem [shape: f32[1,16], index: 14, kind: input, shape index: {}]   ;;  %s3214_s15 = inlined_call_operand.hbm [shape: f32[1,256], index: 15, kind: output, shape index: {}]  }
   0x1   :  { %3246 = sst [smem:[#allocation36_spill]] %s3199_s0 }
   0x2   :  { %3247 = sst [smem:[#allocation37_spill]] %s3200_s1 }
   0x3   :  { %3248 = sst [smem:[#allocation38_spill]] %s3202_s3 }
   0x4   :  { %3249 = sst [smem:[#allocation39_spill]] %s3203_s4 }
   0x5   :  { %3250 = sst [smem:[#allocation40_spill]] %s3204_s5 }
   0x6   :  { %3251 = sst [smem:[#allocation41_spill]] %s3205_s6 }
   0x7   :  { %3252 = sst [smem:[#allocation42_spill]] %s3207_s8 }
   0x8   :  { %3253 = sst [smem:[#allocation43_spill]] %s3208_s9 }
   0x9   :  { %3254 = sst [smem:[#allocation44_spill]] %s3210_s11 }
   0xa   :  { %3255 = sst [smem:[#allocation45_spill]] %s3211_s12 }
   0xb   :  { %3256 = sst [smem:[#allocation46_spill]] %s3212_s13 }
   0xc   :  { %3257 = sst [smem:[#allocation47_spill]] %s3213_s14 }
   0xd   :  { %3258 = sst [smem:[#allocation48_spill]] %s3214_s15 }
   0xe   :  { %20 = vsyncpa [#allocation10], 0 }
   0xf   :  { %22 = vsyncpa [#allocation10 + $0x1], 0 }
  0x10   :  { %23 = vsyncpa [#allocation13], 0 }
  0x11   :  { %25 = vsyncpa [#allocation13 + $0x1], 0 }
  0x12   :  { %26 = vsyncpa [#allocation16], 0 }
  0x13   :  { %27 = vsyncpa [#allocation11], 0 }
  0x14   :  { %29 = vsyncpa [#allocation11 + $0x1], 0  ;;  %s2598_s18 = smov 0   ;;  %s2600_s19 = smov 0  }
  0x15   :  { %s2602_s20 = smov 0   ;;  %s2604_s21 = smov 0  }
  0x16   :  { %s2606_s22 = smov 0   ;;  %s2608_s23 = smov 0  }
  0x17   :  { %s2610_s24 = smov 0   ;;  %s2612_s25 = smov 0  }
  0x18   :  { %s2614_s26 = smov 0   ;;  %s2616_s27 = smov 0  }
  0x19   :  { %s2618_s28 = smov 0  }
  0x1a LB: > { %3259 = sst [smem:[#allocation25_spill]] %s2470_s21  ;;  %s2652_s29 = sadd.s32 4294967295, %s2498_s28   ;;  %s2498_s28 = sphi %s2618_s28, %s35_s28   ;;  %s2494_s27 = sphi %s2616_s27, %s3328_s27   ;;  %s2490_s26 = sphi %s2614_s26, %s3335_s26   ;;  %s2486_s25 = sphi %s2612_s25, %s3326_s25   ;;  %s2482_s24 = sphi %s2610_s24, %s3334_s24   ;;  %s2478_s23 = sphi %s2608_s23, %s3325_s23   ;;  %s2474_s22 = sphi %s2606_s22, %s3333_s22   ;;  %s2470_s21 = sphi %s2604_s21, %s3332_s21   ;;  %s2466_s20 = sphi %s2602_s20, %s3331_s20   ;;  %s2462_s19 = sphi %s2600_s19, %s3330_s19   ;;  %s2458_s18 = sphi %s2598_s18, %s3329_s18  }
  0x1b   : > { %3260 = sst [smem:[#allocation26_spill]] %s2478_s23  ;;  %p299_p0 = scmp.ne.s32.totalorder %s2462_s19, %s2458_s18 }
  0x1c   : > { %3261 = sst [smem:[#allocation27_spill]] %s2482_s24  ;;  %p3217_p1 = scmp.eq.s32.totalorder %s2652_s29, 0 }
  0x1d   : > { %3262 = sst [smem:[#allocation28_spill]] %s2486_s25  ;;  %p1812_p2 = scmp.ge.s32.totalorder %s2498_s28, 1 }
  0x1e   : > { %3263 = sst [smem:[#allocation29_spill]] %s2494_s27  ;;  %p420_p3 = scmp.lt.s32.totalorder %s2498_s28, 9 }
  0x1f   : > { %p2660_p4 = por %p299_p0, %p3217_p1  ;;  %s2500_s17 = smov [#allocation14]  }
  0x20   : > { %p2664_p5 = pnand %p1812_p2, %p420_p3  ;;  %s438_s15 = sshll.u32 %s2500_s17, 4  ;;  %s439_s15 = int_to_ptr.vmem [resolvable:$true] %s438_s15 }
  0x21   : > { %s3264_s30 = scalar_select %p2660_p4, 1, 0 }
  0x22   : > { %s3265_s16 = scalar_select %p2664_p5, 1, 0 }
  0x23   : > { %p1963_p6 = pneg %p2664_p5  ;;  %s3267_s6 = sld [smem:[#allocation41_spill]] }
  0x25   : > { %p2672_p7 = pnand %p1963_p6, %p3217_p1 }
  0x27   : > { %s3266_s18 = scalar_select %p2672_p7, 1, 0 }
  0x28   : > { %p3225_p9 = pneg %p2672_p7 }
  0x29   : > { %s2214_s12 = scalar_lea.hbm %s3267_s6, 4096 }
  0x2a   : > { %p2215_p8 = scmp.ne.s32.totalorder %s3267_s6, %s2214_s12  ;;  %p2221_p12 = scmp.lt.u32.totalorder %s2214_s12, %s3267_s6 }
  0x2c   : > { %p2217_p10 = pnand %p3225_p9, %p2215_p8 }
  0x2e   : > { %p2218_p11 = pneg %p2217_p10 }
  0x30   : > { %p2223_p13 = pnand %p2221_p12, %p2218_p11 }
  0x32   : > { %2226 = shalt.err (!%p2223_p13)
}
  0x33   : > { %s2227_s11 = scalar_lea.vmem %s439_s15, 4096  ;;  %p2235_p6 = scmp.lt.s32.totalorder %s439_s15, %s439_s15 }
  0x34   : > { %p2228_p0 = scmp.ne.s32.totalorder %s439_s15, %s2227_s11  ;;  %p2236_p1 = scmp.lt.s32.totalorder %s2227_s11, %s2227_s11 }
  0x36   : > { %p2230_p2 = pnand %p2228_p0, %p3225_p9  ;;  %p2237_p4 = por %p2236_p1, %p2235_p6 }
  0x38   : > { %p2231_p3 = pneg %p2230_p2 }
  0x3a   : > { %p2238_p5 = pnand %p2237_p4, %p2231_p3 }
  0x3c   : > { %2241 = shalt.err (!%p2238_p5)
}
  0x3d   : > { %s3221_s9 = smov 128   ;;  %s3222_s5 = smov 8  }
  0x3e   : > { %1966 = dma.hbm_to_vmem [thread:$0]  (!%p2672_p7), %s3267_s6, 4096, %s439_s15, [#allocation13], %s3221_s9, %s3221_s9, %s3222_s5  }
  0x3f   : > { %s1811_s14 = sadd.s32 4294967294, %s2498_s28   ;;  %s44_s17 = sadd.s32 1, %s2490_s26 }
  0x40   : > { %s47_s11 = sadd.s32 1, %s2494_s27  ;;  %p45_p1 = scmp.ge.s32.totalorder %s44_s17, 4 }
  0x41   : > { %s82_s8 = sadd.s32 1, %s2478_s23  ;;  %p89_p4 = scmp.ne.s32.totalorder %s2478_s23, %s2474_s22 }
  0x42   : > { %p90_p5 = scmp.eq.s32.totalorder %s2498_s28, 0  ;;  %s3337_s17 = smov (%p45_p1, %s44_s17), 0 }
  0x43   : > { %3268 = sst [smem:[#allocation30_spill]] %s3337_s17  ;;  %s3339_s11 = smov (!%p45_p1, %s47_s11), %s2494_s27 }
  0x44   : > { %p2716_p8 = por %p90_p5, %p89_p4  ;;  %p95_p10 = scmp.ne.s32.totalorder %s2474_s22, %s2470_s21 }
  0x45   : > { %p49_p11 = scmp.ge.s32.totalorder %s3339_s11, 2  ;;  %s283_s12 = ssub.s32 %s2490_s26, %s3337_s17 }
  0x46   : > { %p3270_p12 = scmp.eq.s32.totalorder %s2652_s29, 0  ;;  %p284_p0 = scmp.eq.s32.totalorder %s283_s12, 0 }
  0x47   : > { %s3341_s11 = smov (%p49_p11, %s3339_s11), 0  ;;  %s286_s9 = sadd.s32 1, %s2466_s20 }
  0x48   : > { %p2729_p13 = por %p3270_p12, %p95_p10  ;;  %3272 = sst [smem:[#allocation31_spill]] %s3341_s11 }
  0x49   : > { %p293_p2 = scmp.ne.s32.totalorder %s2466_s20, %s2462_s19  ;;  %s79_s5 = ssub.s32 %s2494_s27, %s3341_s11 }
  0x4a   : > { %s3271_s13 = scalar_select %p2729_p13, 1, 0 }
  0x4b   : > { %p407_p3 = scmp.eq.s32.totalorder %s2652_s29, 7  ;;  %p80_p6 = scmp.eq.s32.totalorder %s79_s5, 0 }
  0x4c   : > { %p2743_p1 = por %p293_p2, %p90_p5  ;;  %p413_p12 = scmp.eq.s32.totalorder %s1811_s14, 7 }
  0x4d   : > { %s2748_s17 = scalar_select %p284_p0, %s2466_s20, %s286_s9  }
  0x4e   : > { %s2751_s12 = scalar_select %p80_p6, %s2478_s23, %s82_s8  }
  0x4f   : > { %3274 = sst [smem:[#allocation32_spill]] %s2748_s17  ;;  %p2756_p11 = por %p407_p3, %p89_p4 }
  0x50   : > { %3275 = sst [smem:[#allocation33_spill]] %s2751_s12  ;;  %p3233_p9 = scmp.lt.s32.totalorder %s2498_s28, 8 }
  0x51   : > { %s3276_s4 = scalar_select %p2756_p11, 1, 0 }
  0x52   : > { %p2765_p13 = por %p413_p12, %p95_p10  ;;  %s496_s0 = sand.u32 1, %s2478_s23  }
  0x53   : > { %3277 = sst [smem:[#allocation34_spill]] %s3276_s4  ;;  %s3229_s3 = sshll.u32 %s2494_s27, 7 }
  0x54   : > { %s3278_s5 = scalar_select %p2765_p13, 1, 0 }
  0x55   : > { %s2771_s25 = sshll.u32 %s496_s0, 3  ;;  %s3280_s1 = sld [smem:[#allocation37_spill]] }
  0x56   : > { %3279 = sst [smem:[#allocation35_spill]] %s3278_s5  ;;  %p2784_p4 = pnand %p3233_p9, %p2716_p8 }
  0x57   : > { %s498_s0 = scalar_lea.vmem [#allocation9], %s2771_s25  ;;  %s3282_s8 = sand.u32 1, %s2498_s28  }
  0x58   : > { %s3281_s14 = scalar_select %p2784_p4, 1, 0 }
  0x59   : > { %s505_s11 = sshll.u32 %s498_s0, 4  ;;  %s2793_s9 = scalar_lea.sflag [#allocation10], %s3282_s8  ;;  %s2789_s11 = int_to_ptr.vmem [resolvable:$true] %s505_s11 }
  0x5a   : > { %p3242_p10 = pneg %p2784_p4 }
  0x5b   : > { %s2778_s12 = scalar_lea.hbm %s3280_s1, %s3229_s3  ;;  %s2247_s17 = scalar_lea.hbm %s3280_s1, 256 }
  0x5c   : > { %s2242_s3 = scalar_lea.hbm %s2778_s12, 128  ;;  %p2248_p2 = scmp.lt.u32.totalorder %s2778_s12, %s3280_s1 }
  0x5d   : > { %p2243_p5 = scmp.ne.s32.totalorder %s2778_s12, %s2242_s3  ;;  %p2249_p3 = scmp.lt.u32.totalorder %s2247_s17, %s2242_s3 }
  0x5e   : > { %p2251_p12 = scmp.lt.u32.totalorder %s2242_s3, %s2778_s12 }
  0x5f   : > { %p2245_p0 = pnand %p3242_p10, %p2243_p5  ;;  %p2250_p6 = por %p2249_p3, %p2248_p2 }
  0x61   : > { %p2246_p8 = pneg %p2245_p0  ;;  %p2252_p9 = por %p2251_p12, %p2250_p6 }
  0x63   : > { %p2253_p13 = pnand %p2252_p9, %p2246_p8 }
  0x65   : > { %2256 = shalt.err (!%p2253_p13)
}
  0x66   : > { %s2257_s0 = scalar_lea.vmem %s2789_s11, 128  ;;  %s2503_s23 = smov [#allocation9]  }
  0x67   : > { %p2258_p5 = scmp.ne.s32.totalorder %s2789_s11, %s2257_s0  ;;  %s2262_s8 = sshll.u32 %s2503_s23, 4  ;;  %s2263_s8 = int_to_ptr.vmem [resolvable:$false] %s2262_s8 }
  0x68   : > { %s2264_s21 = scalar_lea.vmem %s2263_s8, 256  ;;  %p2265_p7 = scmp.lt.s32.totalorder %s2789_s11, %s2263_s8 }
  0x69   : > { %p2260_p0 = pnand %p2258_p5, %p3242_p10  ;;  %p2266_p2 = scmp.lt.s32.totalorder %s2264_s21, %s2257_s0 }
  0x6b   : > { %p2261_p11 = pneg %p2260_p0  ;;  %p2267_p3 = por %p2266_p2, %p2265_p7 }
  0x6d   : > { %p2268_p6 = pnand %p2267_p3, %p2261_p11 }
  0x6f   : > { %2271 = shalt.err (!%p2268_p6)
}
  0x70   : > { %1973 = dma.hbm_to_vmem [thread:$0]  (!%p2784_p4), %s2778_s12, 128, %s2789_s11, %s2793_s9  }
  0x71   : > { %s3283_s3 = sshll.u32 %s2494_s27, 7  ;;  %p3284_p7 = scmp.lt.s32.totalorder %s2498_s28, 8 }
  0x72   : > { %s2826_s15 = scalar_lea.hbm %s3201_s2, %s3283_s3  ;;  %s2504_s23 = smov [#allocation15]  }
  0x73   : > { %p2832_p9 = pnand %p3284_p7, %p2743_p1  ;;  %s452_s8 = sshll.u32 %s2504_s23, 4  ;;  %s453_s8 = int_to_ptr.vmem [resolvable:$true] %s452_s8 }
  0x74   : > { %s516_s21 = scalar_lea.vmem [#allocation12], %s2771_s25  ;;  %s2272_s11 = scalar_lea.hbm %s3206_s7, 32 }
  0x75   : > { %s3285_s0 = scalar_select %p2832_p9, 1, 0 }
  0x76   : > { %s523_s1 = sshll.u32 %s516_s21, 4  ;;  %p2273_p13 = scmp.ne.s32.totalorder %s3206_s7, %s2272_s11  ;;  %s2857_s1 = int_to_ptr.vmem [resolvable:$true] %s523_s1 }
  0x77   : > { %p3286_p11 = scmp.ne.s32.totalorder %s3266_s18, 0  ;;  %p2279_p5 = scmp.lt.u32.totalorder %s2272_s11, %s3206_s7 }
  0x79   : > { %p3287_p8 = pneg %p3286_p11 }
  0x7b   : > { %p2275_p12 = pnand %p2273_p13, %p3287_p8 }
  0x7d   : > { %p2276_p1 = pneg %p2275_p12 }
  0x7f   : > { %p2281_p0 = pnand %p2279_p5, %p2276_p1 }
  0x81   : > { %2284 = shalt.err (!%p2281_p0)
}
  0x82   : > { %s2285_s25 = scalar_lea.vmem %s453_s8, 32  ;;  %p3288_p3 = pmov %p3287_p8 }
  0x83   : > { %p2286_p2 = scmp.ne.s32.totalorder %s453_s8, %s2285_s25  ;;  %p2293_p10 = scmp.lt.s32.totalorder %s453_s8, %s453_s8 }
  0x84   : > { %p2294_p9 = scmp.lt.s32.totalorder %s2285_s25, %s2285_s25 }
  0x85   : > { %p2288_p6 = pnand %p2286_p2, %p3288_p3 }
  0x86   : > { %p2295_p4 = por %p2294_p9, %p2293_p10 }
  0x87   : > { %p2289_p7 = pneg %p2288_p6 }
  0x89   : > { %p2296_p8 = pnand %p2295_p4, %p2289_p7 }
  0x8b   : > { %2299 = shalt.err (!%p2296_p8)
}
  0x8c   : > { %1969 = dma.hbm_to_vmem [thread:$0]  (!%p3286_p11), %s3206_s7, 32, %s453_s8, [#allocation16]  }
  0x8d   : > { %s539_s27 = sand.u32 1, %s2466_s20   ;;  %s3289_s17 = sand.u32 1, %s2498_s28  }
  0x8e   : > { %s513_s5 = scalar_lea.sflag [#allocation13], %s3289_s17  ;;  %s2300_s23 = scalar_lea.hbm %s2826_s15, 128 }
  0x8f   : > { %p2301_p4 = scmp.ne.s32.totalorder %s2826_s15, %s2300_s23  ;;  %p3290_p10 = scmp.ne.s32.totalorder %s3281_s14, 0 }
  0x90   : > { %s2305_s11 = scalar_lea.hbm %s3201_s2, 256  ;;  %p2306_p1 = scmp.lt.u32.totalorder %s2826_s15, %s3201_s2 }
  0x91   : > { %p3291_p9 = pneg %p3290_p10  ;;  %p2307_p11 = scmp.lt.u32.totalorder %s2305_s11, %s2300_s23 }
  0x92   : > { %p2309_p0 = scmp.lt.u32.totalorder %s2300_s23, %s2826_s15 }
  0x93   : > { %p2303_p13 = pnand %p2301_p4, %p3291_p9  ;;  %p2308_p5 = por %p2307_p11, %p2306_p1 }
  0x95   : > { %p2304_p12 = pneg %p2303_p13  ;;  %p2310_p2 = por %p2309_p0, %p2308_p5 }
  0x97   : > { %p2311_p3 = pnand %p2310_p2, %p2304_p12 }
  0x99   : > { %2314 = shalt.err (!%p2311_p3)
}
  0x9a   : > { %s2315_s8 = scalar_lea.vmem %s2857_s1, 128  ;;  %p3292_p7 = pmov %p3291_p9 }
  0x9b   : > { %p2316_p6 = scmp.ne.s32.totalorder %s2857_s1, %s2315_s8  ;;  %s2505_s3 = smov [#allocation12]  }
  0x9c   : > { %s2320_s25 = sshll.u32 %s2505_s3, 4  ;;  %s2321_s25 = int_to_ptr.vmem [resolvable:$false] %s2320_s25 }
  0x9d   : > { %p2318_p8 = pnand %p2316_p6, %p3292_p7  ;;  %s2322_s4 = scalar_lea.vmem %s2321_s25, 256 }
  0x9e   : > { %p2323_p9 = scmp.lt.s32.totalorder %s2857_s1, %s2321_s25  ;;  %p2324_p13 = scmp.lt.s32.totalorder %s2322_s4, %s2315_s8 }
  0x9f   : > { %p2319_p4 = pneg %p2318_p8 }
  0xa0   : > { %p2325_p1 = por %p2324_p13, %p2323_p9 }
  0xa2   : > { %p2326_p11 = pnand %p2325_p1, %p2319_p4 }
  0xa4   : > { %2329 = shalt.err (!%p2326_p11)
}
  0xa5   : > { %1976 = dma.hbm_to_vmem [thread:$0]  (!%p3290_p10), %s2826_s15, 128, %s2857_s1, %s513_s5  }
  0xa6   : > { %s1820_s24 = sshll.u32 %s539_s27, 4  ;;  %s1911_s17 = sshll.u32 %s2490_s26, 7 }
  0xa7   : > { %s2891_s21 = scalar_lea.hbm %s3209_s10, %s1911_s17  ;;  %s541_s14 = scalar_lea.vmem [#allocation17], %s1820_s24 }
  0xa8   : > { %s548_s11 = sshll.u32 %s541_s14, 4  ;;  %s2330_s12 = scalar_lea.hbm %s2891_s21, 256  ;;  %s2893_s11 = int_to_ptr.vmem [resolvable:$true] %s548_s11 }
  0xa9   : > { %p2331_p12 = scmp.ne.s32.totalorder %s2891_s21, %s2330_s12  ;;  %p3293_p5 = scmp.ne.s32.totalorder %s3285_s0, 0 }
  0xaa   : > { %s2335_s27 = scalar_lea.hbm %s3209_s10, 1024  ;;  %p2336_p3 = scmp.lt.u32.totalorder %s2891_s21, %s3209_s10 }
  0xab   : > { %p2332_p10 = pneg %p3293_p5  ;;  %p2337_p6 = scmp.lt.u32.totalorder %s2335_s27, %s2330_s12 }
  0xac   : > { %p2339_p8 = scmp.lt.u32.totalorder %s2330_s12, %s2891_s21 }
  0xad   : > { %p2333_p0 = pnand %p2332_p10, %p2331_p12  ;;  %p2338_p7 = por %p2337_p6, %p2336_p3 }
  0xaf   : > { %p2334_p2 = pneg %p2333_p0  ;;  %p2340_p4 = por %p2339_p8, %p2338_p7 }
  0xb1   : > { %p2341_p9 = pnand %p2340_p4, %p2334_p2 }
  0xb3   : > { %2344 = shalt.err (!%p2341_p9)
}
  0xb4   : > { %s2345_s8 = scalar_lea.vmem %s2893_s11, 256  ;;  %s2506_s3 = smov [#allocation17]  }
  0xb5   : > { %p2346_p13 = scmp.ne.s32.totalorder %s2893_s11, %s2345_s8  ;;  %s2350_s25 = sshll.u32 %s2506_s3, 4  ;;  %s2351_s25 = int_to_ptr.vmem [resolvable:$false] %s2350_s25 }
  0xb6   : > { %s2352_s4 = scalar_lea.vmem %s2351_s25, 512  ;;  %p2353_p12 = scmp.lt.s32.totalorder %s2893_s11, %s2351_s25 }
  0xb7   : > { %p2348_p1 = pnand %p2346_p13, %p2332_p10  ;;  %p2354_p0 = scmp.lt.s32.totalorder %s2352_s4, %s2345_s8 }
  0xb9   : > { %p2349_p11 = pneg %p2348_p1  ;;  %p2355_p3 = por %p2354_p0, %p2353_p12 }
  0xbb   : > { %p2356_p6 = pnand %p2355_p3, %p2349_p11 }
  0xbd   : > { %2359 = shalt.err (!%p2356_p6)
}
  0xbe   : > { %s2507_s24 = smov 512   ;;  %s3294_s17 = smov 8  }
  0xbf   : > { %s3295_s23 = smov 128   ;;  %p3296_p10 = scmp.ne.s32.totalorder %s3265_s16, 0 }
  0xc0   : > { %1979 = dma.hbm_to_vmem [thread:$0]  (!%p3293_p5), %s2891_s21, 256, %s2893_s11, %s2793_s9, %s2507_s24, %s3295_s23, %s3294_s17  }
  0xc1   : > { %560 = sbr.rel (%p3296_p10) target bundleno = 2851 (0xb23), region = 80  ;;  %s562_s18 = sand.u32 (!%p3296_p10), 1, %s2652_s29  }
  0xc2   : > { %s2927_s14 = sand.u32 (!%p3296_p10), 1, %s2474_s22   ;;  %s563_s1 = scalar_lea.sflag (!%p3296_p10), [#allocation10], %s562_s18 }
  0xc3   : > { %s1824_s12 = sshll.u32 (!%p3296_p10), %s2927_s14, 3  ;;  %p3297_p2 = scmp.ne.s32.totalorder (!%p3296_p10), %s3271_s13, 0 }
  0xc4   : > { %s2930_s15 = scalar_lea.vmem (!%p3296_p10), [#allocation9], %s1824_s12 }
  0xc8   : > { %2433 = dma.done.wait (%p3297_p2), %s563_s1, 128  }
  0xc9   : > { %2435 = vsyncadd (%p3297_p2), %s563_s1, 4294967168  ;;  %s572_s9 = scalar_lea.sflag [#allocation13], %s562_s18  ;;  %s2936_s16 = scalar_lea.vmem [#allocation12], %s1824_s12 }
  0xca   : > { %2437 = dma.done.wait (%p3297_p2), %s572_s9, 128  }
  0xcb   : > { %2439 = vsyncadd (%p3297_p2), %s572_s9, 4294967168  ;;  %p3298_p5 = scmp.eq.s32.totalorder %s2652_s29, 0 }
  0xcd   : > { %2441 = dma.done.wait (%p3298_p5), [#allocation13], 4096   ;;  %p3299_p7 = pmov %p3298_p5 }
  0xce   : > { %p3300_p8 = pmov %p3298_p5 }
  0xcf   : > { %2443 = vsyncadd (%p3299_p7), [#allocation13], 4294963200 }
  0xd0   : > { %2445 = dma.done.wait (%p3300_p8), [#allocation16], 32   ;;  %p3301_p4 = pmov %p3298_p5 }
  0xd1   : > { %s590_s0 = sand.u32 1, %s2462_s19   ;;  %p3302_p9 = scmp.ne.s32.totalorder %s3264_s30, 0 }
  0xd2   : > { %2447 = vsyncadd (%p3301_p4), [#allocation16], 4294967264  ;;  %s2951_s21 = sshll.u32 %s590_s0, 4 }
  0xd3   : > { %s592_s13 = scalar_lea.vmem [#allocation17], %s2951_s21 }
  0xd4   : > { %2449 = dma.done.wait (%p3302_p9), %s563_s1, 256  }
  0xd5   : > { %2451 = vsyncadd (%p3302_p9), %s563_s1, 4294967040  ;;  %s3303_s11 = sld [smem:[#allocation27_spill]]  ;;  %s3304_s27 = sld [smem:[#allocation28_spill]] }
  0xd6   : > { %s3305_s25 = sld [smem:[#allocation38_spill]]  ;;  %s3306_s23 = sld [smem:[#allocation36_spill]] }
  0xd7   : > { %s660_s12 = scalar_lea.vmem [#allocation18], %s2927_s14 }
  0xdb   : > { %s1829_s5 = sshll.u32 %s3303_s11, 1  ;;  %p662_p13 = scmp.lt.s32.totalorder %s3304_s27, 1 }
  0xdc   : > { %p664_p1 = scmp.lt.s32.totalorder %s1829_s5, 7  ;;  %p1833_p11 = scmp.ne.s32.totalorder %s3303_s11, 0 }
  0xdd   : > { %s3343_s27 = smov (!%p662_p13, %s3304_s27), 1  ;;  %s3307_s0 = sld [smem:[#allocation39_spill]] (!%p1833_p11)  ;;  %v2508_v2 = vmov (!%p1833_p11), 0   ;;  %v2116_v10 = vld [vmem:[#allocation14 + $0x4] ss:$8 sps:$4 sm:$0xff] (!%p1833_p11)   ;;  %v701_v55 = vlaneseq (!%p1833_p11)  ;;  %vm1280_vm0 = vcmask (!%p1833_p11), 130048  }
  0xde   : > { %s3345_s5 = smov (!%p664_p1, %s1829_s5), 7  ;;  %s1830_s29 = sshll.u32 %s3343_s27, 3  ;;  %823 = vmatprep.mubr.bf16.mxu0 (!%p1833_p11), %v2508_v2  ;;  %v2118_v11 = vld [vmem:[#allocation14] ss:$8 sps:$4 sm:$0xff] (!%p1833_p11)   ;;  %1048 = vmatprep.subr.bf16.mxu1 (!%p1833_p11), %v2116_v10  ;;  %v2119_v12 = vld [vmem:[#allocation14 + $0x14] ss:$8 sps:$4 sm:$0xff] (!%p1833_p11)  }
  0xdf   : > { %s667_s6 = sadd.s32 %s1830_s29, %s3345_s5  ;;  %s2964_s4 = scalar_lea.vmem %s3305_s25, %s1830_s29  ;;  %1049 = vmatpush1.bf16.msra.mxu1 (!%p1833_p11), %v2118_v11  ;;  %v2121_v14 = vld [vmem:[#allocation14 + $0x10] ss:$8 sps:$4 sm:$0xff] (!%p1833_p11)   ;;  %v2122_v15 = vld [vmem:[#allocation14 + $0x24] ss:$8 sps:$4 sm:$0xff] (!%p1833_p11)   ;;  %v2124_v18 = vld [vmem:[#allocation14 + $0x20] ss:$8 sps:$4 sm:$0xff] (!%p1833_p11)  }
  0xe0   : > { %s1831_s24 = sshll.u32 %s667_s6, 2  ;;  %680 = sbr.rel (%p1833_p11) target bundleno = 1993 (0x7c9), region = 104  ;;  %1050 = vmatprep.subr.bf16.mxu1 (!%p1833_p11), %v2119_v12  ;;  %v2125_v19 = vld [vmem:[#allocation14 + $0x34] ss:$8 sps:$4 sm:$0xff] (!%p1833_p11)   ;;  %v2127_v22 = vld [vmem:[#allocation14 + $0x30] ss:$8 sps:$4 sm:$0xff] (!%p1833_p11)  }
  0xe1   : > { %s2969_s18 = scalar_lea.vmem %s3306_s23, %s1831_s24  ;;  %v2128_v23 = vld [vmem:[#allocation14 + $0x44] ss:$8 sps:$4 sm:$0xff] (!%p1833_p11)   ;;  %v2130_v25 = vld [vmem:[#allocation14 + $0x40] ss:$8 sps:$4 sm:$0xff] (!%p1833_p11)   ;;  %v2131_v28 = vld [vmem:[#allocation14 + $0x54] ss:$8 sps:$4 sm:$0xff] (!%p1833_p11)  }
  0xe2   : > { %v681_v27 = vld [vmem:[%s2930_s15] sm:$0xff] (!%p1833_p11)  ;;  %v2133_v29 = vld [vmem:[#allocation14 + $0x50] ss:$8 sps:$4 sm:$0xff] (!%p1833_p11)   ;;  %v2137_v33 = vld [vmem:[#allocation14 + $0x74] ss:$8 sps:$4 sm:$0xff] (!%p1833_p11)   ;;  %s3308_s6 = sld [smem:[#allocation42_spill]] (!%p1833_p11) }
  0xe3   : > { %v2092_v0 = vld [vmem:[%s3307_s0 + $0x4] ss:$8 sps:$4 sm:$0xff] (!%p1833_p11)   ;;  %v2094_v1 = vld [vmem:[%s3307_s0] ss:$8 sps:$4 sm:$0xff] (!%p1833_p11)   ;;  %v2095_v3 = vld [vmem:[%s3307_s0 + $0x14] ss:$8 sps:$4 sm:$0xff] (!%p1833_p11)   ;;  %1051 = vmatpush1.bf16.msra.mxu1 (!%p1833_p11), %v2121_v14  ;;  %v682_v31 = vpack.c.bf16 (!%p1833_p11), %v681_v27, %v681_v27 }
  0xe4   : > { %791 = vmatprep.subr.bf16.mxu0 (!%p1833_p11), %v2092_v0  ;;  %v2097_v4 = vld [vmem:[%s3307_s0 + $0x10] ss:$8 sps:$4 sm:$0xff] (!%p1833_p11)   ;;  %v2098_v5 = vld [vmem:[%s3307_s0 + $0x24] ss:$8 sps:$4 sm:$0xff] (!%p1833_p11)   ;;  %v2100_v6 = vld [vmem:[%s3307_s0 + $0x20] ss:$8 sps:$4 sm:$0xff] (!%p1833_p11)   ;;  %1052 = vmatprep.subr.bf16.mxu1 (!%p1833_p11), %v2122_v15 }
  0xe5   : > { %792 = vmatpush1.bf16.msra.mxu0 (!%p1833_p11), %v2094_v1  ;;  %v2101_v7 = vld [vmem:[%s3307_s0 + $0x34] ss:$8 sps:$4 sm:$0xff] (!%p1833_p11)   ;;  %v2103_v8 = vld [vmem:[%s3307_s0 + $0x30] ss:$8 sps:$4 sm:$0xff] (!%p1833_p11)   ;;  %v2104_v9 = vld [vmem:[%s3307_s0 + $0x44] ss:$8 sps:$4 sm:$0xff] (!%p1833_p11)  }
  0xe6   : > { %793 = vmatprep.subr.bf16.mxu0 (!%p1833_p11), %v2095_v3  ;;  %v2106_v13 = vld [vmem:[%s3307_s0 + $0x40] ss:$8 sps:$4 sm:$0xff] (!%p1833_p11)   ;;  %v2107_v16 = vld [vmem:[%s3307_s0 + $0x54] ss:$8 sps:$4 sm:$0xff] (!%p1833_p11)   ;;  %v2109_v17 = vld [vmem:[%s3307_s0 + $0x50] ss:$8 sps:$4 sm:$0xff] (!%p1833_p11)  }
  0xe7   : > { %v2110_v20 = vld [vmem:[%s3307_s0 + $0x64] ss:$8 sps:$4 sm:$0xff]   ;;  %v2112_v21 = vld [vmem:[%s3307_s0 + $0x60] ss:$8 sps:$4 sm:$0xff]   ;;  %1053 = vmatpush1.bf16.msra.mxu1 %v2124_v18  ;;  %v2113_v24 = vld [vmem:[%s3307_s0 + $0x74] ss:$8 sps:$4 sm:$0xff]  }
  0xe8   : > { %1054 = vmatprep.subr.bf16.mxu1 %v2125_v19  ;;  %v2115_v26 = vld [vmem:[%s3307_s0 + $0x70] ss:$8 sps:$4 sm:$0xff]   ;;  %v2134_v30 = vld [vmem:[#allocation14 + $0x64] ss:$8 sps:$4 sm:$0xff]   ;;  %v2143_v37 = vld [vmem:[#allocation14 + $0x94] ss:$8 sps:$4 sm:$0xff]  }
  0xe9   : > { %794 = vmatpush1.bf16.msra.mxu0 %v2097_v4  ;;  %v2136_v32 = vld [vmem:[#allocation14 + $0x60] ss:$8 sps:$4 sm:$0xff]   ;;  %v2139_v34 = vld [vmem:[#allocation14 + $0x70] ss:$8 sps:$4 sm:$0xff]   ;;  %v2140_v35 = vld [vmem:[#allocation14 + $0x84] ss:$8 sps:$4 sm:$0xff]  }
  0xea   : > { %795 = vmatprep.subr.bf16.mxu0 %v2098_v5  ;;  %v2142_v36 = vld [vmem:[#allocation14 + $0x80] ss:$8 sps:$4 sm:$0xff]   ;;  %v2145_v38 = vld [vmem:[#allocation14 + $0x90] ss:$8 sps:$4 sm:$0xff]   ;;  %v2146_v39 = vld [vmem:[#allocation14 + $0xa4] ss:$8 sps:$4 sm:$0xff]  }
  0xeb   : > { %1055 = vmatpush1.bf16.msra.mxu1 %v2127_v22  ;;  %v2148_v40 = vld [vmem:[#allocation14 + $0xa0] ss:$8 sps:$4 sm:$0xff]   ;;  %v2149_v41 = vld [vmem:[#allocation14 + $0xb4] ss:$8 sps:$4 sm:$0xff]   ;;  %v2151_v42 = vld [vmem:[#allocation14 + $0xb0] ss:$8 sps:$4 sm:$0xff]  }
  0xec   : > { %1056 = vmatprep.subr.bf16.mxu1 %v2128_v23  ;;  %v2152_v43 = vld [vmem:[#allocation14 + $0xc4] ss:$8 sps:$4 sm:$0xff]   ;;  %v2154_v44 = vld [vmem:[#allocation14 + $0xc0] ss:$8 sps:$4 sm:$0xff]   ;;  %v2155_v45 = vld [vmem:[#allocation14 + $0xd4] ss:$8 sps:$4 sm:$0xff]  }
  0xed   : > { %796 = vmatpush1.bf16.msra.mxu0 %v2100_v6  ;;  %v2157_v46 = vld [vmem:[#allocation14 + $0xd0] ss:$8 sps:$4 sm:$0xff]   ;;  %v2158_v47 = vld [vmem:[#allocation14 + $0xe4] ss:$8 sps:$4 sm:$0xff]   ;;  %v2160_v48 = vld [vmem:[#allocation14 + $0xe0] ss:$8 sps:$4 sm:$0xff]  }
  0xee   : > { %797 = vmatprep.subr.bf16.mxu0 %v2101_v7  ;;  %v2161_v49 = vld [vmem:[#allocation14 + $0xf4] ss:$8 sps:$4 sm:$0xff]   ;;  %v2163_v50 = vld [vmem:[#allocation14 + $0xf0] ss:$8 sps:$4 sm:$0xff]   ;;  %v2164_v51 = vld [vmem:[%s3308_s6 + $0x40] sm:$0xff]   ;;  %v702_v56 = vshrl.u32 %v701_v55, 7 }
  0xef   : > { %1057 = vmatpush1.bf16.msra.mxu1 %v2130_v25  ;;  %v2165_v52 = vld [vmem:[%s3308_s6] sm:$0xff]   ;;  %v2166_v53 = vld [vmem:[%s3308_s6 + $0x48] sm:$0xff]   ;;  %s3309_s1 = sld [smem:[#allocation40_spill]]  ;;  %v2170_v18 = vld [vmem:[%s3308_s6 + $0x58] sm:$0xff]   ;;  %s3310_s23 = sld [smem:[#allocation43_spill]]  ;;  %vm2512_vm1 = vmmov 0  }
  0xf0   : > { %1058 = vmatprep.subr.bf16.mxu1 %v2131_v28  ;;  %v2167_v54 = vld [vmem:[%s3308_s6 + $0x8] sm:$0xff]   ;;  %v3034_v57 = vsub.s32 0, %v702_v56  ;;  %v707_v59 = vsub.s32 1, %v702_v56  ;;  %v2171_v19 = vld [vmem:[%s3308_s6 + $0x18] sm:$0xff]   ;;  %v2177_v25 = vld [vmem:[%s3308_s6 + $0x30] sm:$0xff]   ;;  %s3311_s5 = sld [smem:[#allocation47_spill]] }
  0xf1   : > { %798 = vmatpush1.bf16.msra.mxu0 %v2103_v8  ;;  %v2174_v22 = vld [vmem:[%s3308_s6 + $0x68] sm:$0xff]   ;;  %v2179_v27 = vld [vmem:[%s3308_s6 + $0x38] sm:$0xff]   ;;  %s2510_s15 = smov 16   ;;  %s3312_s3 = sld [smem:[#allocation45_spill]]  ;;  %vm1368_vm2 = vcmask 7168  }
  0xf2   : > { %799 = vmatprep.subr.bf16.mxu0 %v2104_v9  ;;  %v2175_v23 = vld [vmem:[%s3308_s6 + $0x28] sm:$0xff]   ;;  %v876_v28 = vld [vmem:[#allocation15] sm:$0x3]  ;;  %s3313_s30 = sld [smem:[#allocation46_spill]]  ;;  %s3314_s27 = sld [smem:[#allocation44_spill]] }
  0xf3   : > { %1059 = vmatpush1.bf16.msra.mxu1 %v2133_v29  ;;  %v881_v29 = vrot.slane %v876_v28, %v3034_v57 }
  0xf4   : > { %1060 = vmatprep.subr.bf16.mxu1 %v2134_v30  ;;  %v885_v30 = vrot.slane %v876_v28, %v707_v59 }
  0xf5   : > { %800 = vmatpush1.bf16.msra.mxu0 %v2106_v13  ;;  %v699_v58 = vld [vmem:[%s3309_s1] sm:$0x3]  ;;  %s2509_s1 = smov 112  }
  0xf6   : > { %801 = vmatprep.subr.bf16.mxu0 %v2107_v16  ;;  %v704_v60 = vrot.slane %v699_v58, %v3034_v57  ;;  %v708_v61 = vrot.slane %v699_v58, %v707_v59  ;;  %v2168_v16 = vld [vmem:[%s3308_s6 + $0x50] sm:$0xff]  }
  0xf7   : > { %1061 = vmatpush1.bf16.msra.mxu1 %v2136_v32 }
  0xf8   : > { %1062 = vmatprep.subr.bf16.mxu1 %v2137_v33 }
  0xf9   : > { %802 = vmatpush1.bf16.msra.mxu0 %v2109_v17  ;;  %v2169_v17 = vld [vmem:[%s3308_s6 + $0x10] sm:$0xff]  }
  0xfa   : > { %803 = vmatprep.subr.bf16.mxu0 %v2110_v20  ;;  %v2172_v20 = vld [vmem:[%s3308_s6 + $0x60] sm:$0xff]  }
  0xfb   : > { %1063 = vmatpush1.bf16.msra.mxu1 %v2139_v34 }
  0xfc   : > { %1064 = vmatprep.subr.bf16.mxu1 %v2140_v35 }
  0xfd   : > { %804 = vmatpush1.bf16.msra.mxu0 %v2112_v21  ;;  %v2173_v21 = vld [vmem:[%s3308_s6 + $0x20] sm:$0xff]  }
  0xfe   : > { %805 = vmatprep.subr.bf16.mxu0 %v2113_v24  ;;  %v2176_v24 = vld [vmem:[%s3308_s6 + $0x70] sm:$0xff]  }
  0xff   : > { %1065 = vmatpush1.bf16.msra.mxu1 %v2142_v36 }
 0x100   : > { %1066 = vmatprep.subr.bf16.mxu1 %v2143_v37 }
 0x101   : > { %806 = vmatpush1.bf16.msra.mxu0 %v2115_v26  ;;  %v2178_v26 = vld [vmem:[%s3308_s6 + $0x78] sm:$0xff]  }
 0x102   : > { %1912 = vmatprep.subr.bf16.mxu0 %v2164_v51 }
 0x103   : > { %1067 = vmatpush1.bf16.msra.mxu1 %v2145_v38 }
 0x104   : > { %824 = vmatmul.mubr.bf16.vlgmr.msra.gmra.mrb[0].mxu0 %v682_v31  ;;  %1068 = vmatprep.subr.bf16.mxu1 %v2146_v39 }
 0x105   : > { %1913 = vmatpush3.bf16.msra.mxu0 %v2165_v52 }
 0x106   : > { %1914 = vmatprep.subr.bf16.mxu0 %v2166_v53 }
 0x107   : > { %1069 = vmatpush1.bf16.msra.mxu1 %v2148_v40 }
 0x108   : > { %1070 = vmatprep.subr.bf16.mxu1 %v2149_v41 }
 0x109   : > { %1915 = vmatpush3.bf16.msra.mxu0 %v2167_v54 }
 0x10a   : > { %1916 = vmatprep.subr.bf16.mxu0 %v2168_v16  ;;  %v2513_v16 = vmov 0.0  }
 0x10b   : > { %1071 = vmatpush1.bf16.msra.mxu1 %v2151_v42  ;;  %1469 = vst.msk [vmem:[#allocation7] sm:$0xff] %vm1368_vm2, %v2513_v16  ;;  %1470 = vst.msk [vmem:[#allocation8] sm:$0xff] %vm1368_vm2, %v2513_v16 }
 0x10c   : > { %1072 = vmatprep.subr.bf16.mxu1 %v2152_v43 }
 0x10d   : > { %1917 = vmatpush3.bf16.msra.mxu0 %v2169_v17  ;;  %v2514_v17 = vmov -inf  }
 0x10e   : > { %1918 = vmatprep.subr.bf16.mxu0 %v2170_v18  ;;  %1468 = vst.msk [vmem:[#allocation6] sm:$0xff] %vm1368_vm2, %v2514_v17 }
 0x10f   : > { %1073 = vmatpush1.bf16.msra.mxu1 %v2154_v44 }
 0x110   : > { %1074 = vmatprep.subr.bf16.mxu1 %v2155_v45 }
 0x111   : > { %1919 = vmatpush3.bf16.msra.mxu0 %v2171_v19 }
 0x112   : > { %1920 = vmatprep.subr.bf16.mxu0 %v2172_v20 }
 0x113   : > { %1075 = vmatpush1.bf16.msra.mxu1 %v2157_v46 }
 0x114   : > { %1076 = vmatprep.subr.bf16.mxu1 %v2158_v47 }
 0x115   : > { %1921 = vmatpush3.bf16.msra.mxu0 %v2173_v21  ;;  %v1299_v21 = vld [vmem:[%s2936_s16] sm:$0xff] }
 0x116   : > { %1922 = vmatprep.subr.bf16.mxu0 %v2174_v22  ;;  %v1300_v22 = vmul.f32 -0.5, %v1299_v21 }
 0x117   : > { %1077 = vmatpush1.bf16.msra.mxu1 %v2160_v48 }
 0x118   : > { %1078 = vmatprep.subr.bf16.mxu1 %v2161_v49 }
 0x119   : > { %1923 = vmatpush3.bf16.msra.mxu0 %v2175_v23  ;;  %v1301_v23 = vmul.f32 %v1300_v22, %v1299_v21 }
 0x11a   : > { %1924 = vmatprep.subr.bf16.mxu0 %v2176_v24 }
 0x11b   : > { %1079 = vmatpush1.bf16.msra.mxu1 %v2163_v50  ;;  %v1882_v50 = vld [vmem:[%s3310_s23] ss:$0 sm:$0xff] }
 0x11d   : > { %1925 = vmatpush3.bf16.msra.mxu0 %v2177_v25 }
 0x11e   : > { %1926 = vmatprep.subr.bf16.mxu0 %v2178_v26 }
 0x121   : > { %1927 = vmatpush3.bf16.msra.mxu0 %v2179_v27  ;;  %v1899_v27 = vld [vmem:[%s3313_s30] ss:$0 sm:$0xff] }
 0x1d7   : > { %v825_v62 = vpop.f32.mrb[0].mxu0 }
 0x1d8   : > { %v826_v63 = vadd.f32 %v825_v62, %v704_v60  ;;  %v827_v0 = vpop.f32.mrb[1].mxu0 }
 0x1d9   : > { %v828_v1 = vadd.f32 %v827_v0, %v708_v61  ;;  %v829_v2 = vpop.f32.mrb[2].mxu0 }
 0x1da   : > { %v834_v3 = vmul.f32 0.70710677, %v826_v63  ;;  %v830_v4 = vpop.f32.mrb[3].mxu0  ;;  %v832_v8 = vmul.f32 0.5, %v826_v63  ;;  %v1312_v63 = vld [vmem:[%s3311_s5] sm:$0x1] }
 0x1db   : > { %v835_v5 = vmul.f32 0.70710677, %v828_v1  ;;  %v833_v10 = vmul.f32 0.5, %v828_v1  ;;  %v3086_v1 = vmul.f32 %v1312_v63, %v1312_v63 }
 0x1dc   : > { %2180 = verf.f32 %v834_v3 }
 0x1dd   : > { %2182 = verf.f32 %v835_v5 }
 0x1e6   : > { %v2181_v6 = vpop.eup %2180 }
 0x1e7   : > { %v2183_v7 = vpop.eup %2182  ;;  %v838_v9 = vadd.f32 1.0, %v2181_v6 }
 0x1e8   : > { %v839_v11 = vadd.f32 1.0, %v2183_v7 }
 0x1e9   : > { %v840_v12 = vmul.f32 %v838_v9, %v832_v8 }
 0x1ea   : > { %v841_v13 = vmul.f32 %v839_v11, %v833_v10  ;;  %v1381_v10 = vld [vmem:[%s3312_s3] sm:$0xff]  ;;  %v1382_v11 = vld [vmem:[%s3312_s3 + $0x8] sm:$0xff] }
 0x1eb   : > { %v842_v15 = vpack.c.bf16 %v840_v12, %v840_v12  ;;  %v1945_v12 = vpack.c.bf16 %v1382_v11, %v1381_v10 }
 0x1ec   : > { %v843_v14 = vpack.c.bf16 %v841_v13, %v841_v13 }
 0x1ee   : > { %1080 = vmatprep.mubr.bf16.mxu1 %v843_v14  ;;  %v2511_v14 = vmov 0.0|0.0  }
 0x1ef   : > { %1081 = vmatmul.mubr.bf16.vlgmr.msra.gmra.mrb[0].mxu1 %v842_v15  ;;  %1944 = vmatprep.subr.bf16.mxu0 %v2511_v14 }
 0x2c2   : > { %v1082_v31 = vpop.f32.mrb[0].mxu1 }
 0x2c3   : > { %v1083_v32 = vadd.f32 %v1082_v31, %v881_v29  ;;  %v1084_v33 = vpop.f32.mrb[1].mxu1  ;;  %v1901_v29 = vld [vmem:[%s3314_s27] ss:$0 sm:$0xff] }
 0x2c4   : > { %v1085_v34 = vadd.f32 %v1084_v33, %v885_v30  ;;  %v1086_v35 = vpop.f32.mrb[2].mxu1 }
 0x2c5   : > { %v1091_v36 = vmul.f32 0.70710677, %v1083_v32  ;;  %v1087_v37 = vpop.f32.mrb[3].mxu1  ;;  %v1089_v41 = vmul.f32 0.5, %v1083_v32 }
 0x2c6   : > { %v1092_v38 = vmul.f32 0.70710677, %v1085_v34  ;;  %v1090_v43 = vmul.f32 0.5, %v1085_v34 }
 0x2c7   : > { %2184 = verf.f32 %v1091_v36 }
 0x2c8   : > { %2186 = verf.f32 %v1092_v38 }
 0x2c9   : > { %2188 = vrcp.f32 %v3086_v1 }
 0x2d1   : > { %v2185_v39 = vpop.eup %2184 }
 0x2d2   : > { %v2187_v40 = vpop.eup %2186  ;;  %v1095_v42 = vadd.f32 1.0, %v2185_v39 }
 0x2d3   : > { %v1096_v44 = vadd.f32 1.0, %v2187_v40  ;;  %v2189_v3 = vpop.eup %2188 }
 0x2d4   : > { %v1097_v45 = vmul.f32 %v1095_v42, %v1089_v41  ;;  %v1323_v4 = vrot.slane %v2189_v3, %v3034_v57 }
 0x2d5   : > { %v1098_v46 = vmul.f32 %v1096_v44, %v1090_v43 }
 0x2d6   : > { %v1099_v48 = vpack.c.bf16 %v1097_v45, %v1097_v45 }
 0x2d7   : > { %v1100_v47 = vpack.c.bf16 %v1098_v46, %v1098_v46 }
 0x2d9   : > { %1268 = vmatprep.mubr.bf16.mxu0 %v1100_v47 }
 0x2da   : > { %1269 = vmatmul.mubr.bf16.vlgmr.msra.gmra.mrb[4].mxu0 %v1099_v48 }
 0x2db   : > { %1946 = vmatpush3.bf16.msra.mxu0 %v1945_v12  ;;  %1941 = vmatprep.mubr.msk.f32.mxu0 %vm2512_vm1, %v2513_v16 }
 0x3ad   : > { %v1928_v49 = vpop.f32.mrb[4].mxu0 }
 0x3ae   : > { %v1929_v51 = vpop.f32.mrb[5].mxu0 }
 0x3af   : > { %v1930_v52 = vadd.f32 %v1929_v51, %v1928_v49  ;;  %v1931_v53 = vpop.f32.mrb[6].mxu0 }
 0x3b0   : > { %v1932_v54 = vpop.f32.mrb[7].mxu0 }
 0x3b1   : > { %v1271_v55 = vadd.f32 %v1930_v52, %v1882_v50 }
 0x3b3   : > { %1277 = vrot.lane.b32.xlu0 %v1271_v55, %s2509_s1  ;;  %v1342_v31 = vsub.f32 %v1899_v27, %v1271_v55 }
 0x3b5   : > { %v1343_v34 = vmul.f32 %v1342_v31, %v1342_v31 }
 0x3b7   : > { %v1344_v37 = vmul.f32 %v1343_v34, %v1323_v4 }
 0x3b9   : > { %v1345_v38 = vsel %vm1280_vm0, %v1344_v37, 0.0 }
 0x425   : > { %v1278_v56 = vpop.permute.xlu0 %1277 }
 0x426   : > { %v1281_v58 = vsel %vm1280_vm0, %v1278_v56, 0.0 }
 0x427   : > { %1282 = vadd.xlane.f32.xlu0 %v1281_v58 }
 0x4b4   : > { %v1283_v59 = vpop.xlane.xlu0 %1282 }
 0x4b5   : > { %v1285_v60 = vmul.f32 0.0625, %v1283_v59 }
 0x4b7   : > { %v1286_v61 = vsub.f32 %v1271_v55, %v1285_v60 }
 0x4b9   : > { %v1287_v62 = vmul.f32 %v1286_v61, %v1286_v61 }
 0x4bb   : > { %1289 = vrot.lane.b32.xlu1 %v1287_v62, %s2509_s1 }
 0x52d   : > { %v1290_v0 = vpop.permute.xlu1 %1289 }
 0x52e   : > { %v1292_v2 = vsel %vm1280_vm0, %v1290_v0, 0.0 }
 0x52f   : > { %1293 = vadd.xlane.f32.xlu1 %v1292_v2 }
 0x540   : > { %1325 = vrot.lane.b32.xlu1 %v1323_v4, %s2510_s15 }
 0x5bc   : > { %v1294_v5 = vpop.xlane.xlu1 %1293 }
 0x5bd   : > { %v1295_v6 = vmul.f32 0.0625, %v1294_v5 }
 0x5bf   : > { %v1296_v7 = vadd.f32 1e-05, %v1295_v6 }
 0x5c0   : > { %v1326_v18 = vpop.permute.xlu1 %1325 }
 0x5c1   : > { %2190 = vrsqrt.f32 %v1296_v7 }
 0x5cb   : > { %v2191_v8 = vpop.eup %2190 }
 0x5cc   : > { %v1298_v9 = vmul.f32 %v2191_v8, %v1286_v61 }
 0x5ce   : > { %1303 = vrot.lane.b32.xlu0 %v1298_v9, %s2509_s1  ;;  %v1316_v13 = vmul.f32 2.0, %v1298_v9 }
 0x5d0   : > { %1357 = vrot.lane.b32.xlu1 %v1316_v13, %s2509_s1  ;;  %v1317_v15 = vmul.f32 1.442695, %v1316_v13 }
 0x5d2   : > { %2192 = vpow2.f32 %v1317_v15 }
 0x5dc   : > { %v2193_v19 = vpop.eup %2192 }
 0x5dd   : > { %v1328_v20 = vmul.f32 %v2193_v19, %v1326_v18 }
 0x5df   : > { %1330 = vrot.lane.b32.xlu0 %v1328_v20, %s2509_s1 }
 0x640   : > { %v1304_v24 = vpop.permute.xlu0 %1303 }
 0x641   : > { %v1306_v25 = vsub.f32 %v1301_v23, %v1304_v24 }
 0x642   : > { %v1358_v44 = vpop.permute.xlu1 %1357 }
 0x643   : > { %v1307_v26 = vmul.f32 1.442695, %v1306_v25 }
 0x645   : > { %2194 = vpow2.f32 %v1307_v26 }
 0x646   : > { %2196 = vlog2.f32 %v3086_v1 }
 0x64f   : > { %v2195_v28 = vpop.eup %2194 }
 0x650   : > { %v1309_v30 = vmul.f32 0.3989423, %v2195_v28  ;;  %v2197_v41 = vpop.eup %2196 }
 0x651   : > { %v1331_v35 = vpop.permute.xlu0 %1330  ;;  %v1349_v42 = vmul.f32 0.6931472, %v2197_v41 }
 0x652   : > { %1310 = vst.msk [vmem:[#allocation2] sm:$0xff] %vm1280_vm0, %v1309_v30  ;;  %1942 = vmatmul.mubr.msk.f32.vlgmr.msra.gmra.mrb[8].mxu0 %vm1280_vm0, %v1309_v30  ;;  %v1377_v32 = vmul.f32 %v1901_v29, %v1309_v30  ;;  %v1333_v36 = vsel %vm1280_vm0, %v1331_v35, 0.0 }
 0x653   : > { %v1354_v43 = vrot.slane %v1349_v42, %v3034_v57 }
 0x654   : > { %v1378_v33 = vsel %vm1280_vm0, %v1377_v32, 0.0 }
 0x655   : > { %1379 = vadd.xlane.f32.xlu0 %v1378_v33  ;;  %v1360_v48 = vsub.f32 %v1354_v43, %v1358_v44 }
 0x657   : > { %v1361_v50 = vsel %vm1280_vm0, %v1360_v48, 0.0 }
 0x659   : > { %1334 = vadd.xlane.f32.xlu0 %v1333_v36 }
 0x65d   : > { %1346 = vadd.xlane.f32.xlu0 %v1345_v38 }
 0x6e2   : > { %v1380_v39 = vpop.xlane.xlu0 %1379 }
 0x6e3   : > { %v1460_v40 = vmul.f32 0.001, %v1380_v39 }
 0x6e5   : > { %1464 = vst.msk [vmem:[#allocation4] sm:$0xff] %vm1368_vm2, %v1460_v40  ;;  %v1462_v55 = vmul.f32 %v1460_v40, %v1460_v40 }
 0x6e6   : > { %v1335_v51 = vpop.xlane.xlu0 %1334 }
 0x6ea   : > { %v1347_v52 = vpop.xlane.xlu0 %1346 }
 0x6eb   : > { %v1364_v53 = vadd.f32 %v1347_v52, %v1335_v51 }
 0x6ed   : > { %v1900_v58 = vadd.f32 -16.0, %v1364_v53 }
 0x725   : > { %v1452_v45 = vpop.f32.mrb[8].mxu0 }
 0x726   : > { %v1456_v46 = vmul.f32 %v1452_v45, %v1309_v30  ;;  %v1943_v47 = vpop.f32.mrb[9].mxu0 }
 0x728   : > { %v1457_v49 = vsel %vm1280_vm0, %v1456_v46, 0.0 }
 0x729   : > { %1458 = vadd.xlane.f32.xlu1 %v1457_v49 }
 0x72d   : > { %1362 = vadd.xlane.f32.xlu1 %v1361_v50 }
 0x7b6   : > { %v1459_v54 = vpop.xlane.xlu1 %1458 }
 0x7b7   : > { %v1461_v56 = vmul.f32 0.001, %v1459_v54 }
 0x7b9   : > { %v1463_v59 = vsub.f32 %v1461_v56, %v1462_v55 }
 0x7ba   : > { %v1363_v57 = vpop.xlane.xlu1 %1362 }
 0x7bb   : > { %v1465_v60 = vadd.f32 1e-05, %v1463_v59  ;;  %v1366_v61 = vadd.f32 %v1900_v58, %v1363_v57 }
 0x7bd   : > { %2198 = vrsqrt.f32 %v1465_v60  ;;  %v1367_v62 = vmul.f32 0.5, %v1366_v61 }
 0x7bf   : > { %1369 = vst.msk [vmem:[#allocation3] sm:$0xff] %vm1368_vm2, %v1367_v62 }
 0x7c7   : > { %v2199_v63 = vpop.eup %2198 }
 0x7c8   : > { %1467 = vst.msk [vmem:[#allocation5] sm:$0xff] %vm1368_vm2, %v2199_v63 }
 0x7c9 PF: > { %v2202_v0 = vld [vmem:[%s592_s13 + $0x4] ss:$8 sps:$4 sm:$0xff]   ;;  %v2204_v1 = vld [vmem:[%s592_s13] ss:$8 sps:$4 sm:$0xff]   ;;  %v2515_v2 = vmov 0   ;;  %s3315_s16 = sld [smem:[#allocation27_spill]]  ;;  %v1547_v7 = vlaneseq }
 0x7ca   : > { %1521 = vmatprep.mubr.bf16.mxu0 %v2515_v2  ;;  %v1471_v3 = vld [vmem:[#allocation2] sm:$0xff]  ;;  %2200 = vset.pattern.permute.xlu0 %v2515_v2  ;;  %v1530_v4 = vld [vmem:[#allocation4] sm:$0xff]  ;;  %vm1485_vm3 = vcmask 130048   ;;  %vm1586_vm6 = vcmask 7168   ;;  %v1566_v49 = vld [vmem:[#allocation7] sm:$0xff] }
 0x7cb   : > { %1489 = vmatprep.subr.bf16.mxu0 %v2202_v0  ;;  %v1472_v5 = vpack.c.bf16 %v1471_v3, %v1471_v3  ;;  %1533 = vperm.xlu0 %2200, %v1530_v4   ;;  %v1548_v8 = vand.u32 127, %v1547_v7  ;;  %v1588_v13 = vld [vmem:[%s2969_s18] sm:$0xff]  ;;  %v1591_v44 = vld [vmem:[#allocation8] sm:$0xff] }
 0x7cc   : > { %1490 = vmatpush1.bf16.msra.mxu0 %v2204_v1  ;;  %2201 = vset.pattern.permute.xlu1 %v2515_v2  ;;  %v1589_v18 = vunpack.c.l.bf16 %v1588_v13  ;;  %v1590_v22 = vunpack.c.h.bf16 %v1588_v13  ;;  %v1561_v32 = vld [vmem:[#allocation6] sm:$0xff] }
 0x7cd   : > { %v1549_v9 = vadd.s32 128, %v1548_v8 }
 0x7cf   : > { %v1538_v6 = vld [vmem:[#allocation5] sm:$0xff]  ;;  %1905 = vmatmul.mubr.msk.bf16.vlgmr.msra.gmra.mrb[0].mxu0 %vm1485_vm3, %v1472_v5  ;;  %s1906_s21 = sshll.u32 %s3315_s16, 8  ;;  %p1907_p12 = scmp.ne.s32.totalorder %s3315_s16, 3 }
 0x7d0   : > { %1541 = vperm.xlu0 %2200, %v1538_v6   ;;  %v1550_v10 = vstv %s1906_s21  ;;  %v2516_v54 = vmov (!%p1907_p12), 0   ;;  %v1609_v59 = vld [vmem:[%s2964_s4] sm:$0xff] (!%p1907_p12)  ;;  %v1613_v62 = vld [vmem:[#allocation3] sm:$0xff] (!%p1907_p12) }
 0x7d1   : > { %v1551_v12 = vadd.s32 %v1550_v10, %v1548_v8  ;;  %v1552_v14 = vadd.s32 %v1550_v10, %v1549_v9 }
 0x7d3   : > { %vm1553_vm4 = vcmp.lt.s32.totalorder %v1551_v12, 1000  ;;  %vm1554_vm5 = vcmp.lt.s32.totalorder %v1552_v14, 1000 }
 0x7d4   : > { %2211 = vset.pattern.permute.xlu0 (!%p1907_p12), %v2516_v54 }
 0x84a   : > { %v1534_v11 = vpop.permute.xlu0 %1533 }
 0x84f   : > { %v1542_v19 = vpop.permute.xlu0 %1541 }
 0x8a2   : > { %v1523_v15 = vpop.f32.mrb[0].mxu0 }
 0x8a3   : > { %v1536_v16 = vsub.f32 %v1523_v15, %v1534_v11  ;;  %v1525_v17 = vpop.f32.mrb[1].mxu0 }
 0x8a4   : > { %v1537_v20 = vsub.f32 %v1525_v17, %v1534_v11  ;;  %v1527_v21 = vpop.f32.mrb[2].mxu0 }
 0x8a5   : > { %v1544_v23 = vmul.f32 %v1542_v19, %v1536_v16  ;;  %v1528_v24 = vpop.f32.mrb[3].mxu0 }
 0x8a6   : > { %v1545_v25 = vmul.f32 %v1542_v19, %v1537_v20 }
 0x8a7   : > { %v1559_v26 = vsel %vm1553_vm4, %v1544_v23, -inf  ;;  %v1592_v27 = vmul.f32 %v1589_v18, %v1544_v23 }
 0x8a8   : > { %v1560_v28 = vsel %vm1554_vm5, %v1545_v25, -inf  ;;  %v1593_v29 = vmul.f32 %v1590_v22, %v1545_v25 }
 0x8a9   : > { %v1562_v30 = vmax.f32 %v1559_v26, %v1560_v28 }
 0x8aa   : > { %v1594_v31 = vadd.f32 %v1593_v29, %v1592_v27 }
 0x8ab   : > { %1563 = vmax.xlane.f32.xlu1 %v1562_v30 }
 0x938   : > { %v1564_v33 = vpop.xlane.xlu1 %1563 }
 0x939   : > { %v1565_v34 = vmax.f32 %v1561_v32, %v1564_v33 }
 0x93b   : > { %v1567_v35 = vsub.f32 %v1561_v32, %v1565_v34  ;;  %1599 = vst.msk [vmem:[#allocation6] sm:$0xff] %vm1586_vm6, %v1565_v34  ;;  %1573 = vperm.xlu1 %2201, %v1565_v34  }
 0x93d   : > { %v1568_v47 = vmul.f32 1.442695, %v1567_v35 }
 0x942   : > { %v1604_v56 = vld [vmem:[#allocation6] sm:$0xff] (!%p1907_p12) }
 0x95f   : > { %1595 = vadd.xlane.f32.xlu1 %v1594_v31 }
 0x9ba   : > { %v1574_v36 = vpop.permute.xlu1 %1573 }
 0x9bb   : > { %v1576_v37 = vsub.f32 %v1559_v26, %v1574_v36  ;;  %v1577_v38 = vsub.f32 %v1560_v28, %v1574_v36 }
 0x9bd   : > { %v1578_v39 = vmul.f32 1.442695, %v1576_v37  ;;  %v1580_v40 = vmul.f32 1.442695, %v1577_v38 }
 0x9bf   : > { %2205 = vpow2.f32 %v1578_v39 }
 0x9c0   : > { %2207 = vpow2.f32 %v1580_v40 }
 0x9c1   : > { %2209 = vpow2.f32 %v1568_v47 }
 0x9c9   : > { %v2206_v41 = vpop.eup %2205 }
 0x9ca   : > { %v2208_v42 = vpop.eup %2207 }
 0x9cb   : > { %v1582_v43 = vadd.f32 %v2208_v42, %v2206_v41  ;;  %v2210_v48 = vpop.eup %2209 }
 0x9cc   : > { %v1570_v50 = vmul.f32 %v2210_v48, %v1566_v49 }
 0x9cd   : > { %1583 = vadd.xlane.f32.xlu0 %v1582_v43 }
 0x9ec   : > { %v1596_v45 = vpop.xlane.xlu1 %1595 }
 0x9ed   : > { %v1597_v46 = vadd.f32 %v1596_v45, %v1591_v44 }
 0x9ef   : > { %1598 = vst.msk [vmem:[#allocation8] sm:$0xff] %vm1586_vm6, %v1597_v46 }
 0x9f6   : > { %v1611_v60 = vld [vmem:[#allocation8] sm:$0xff] (!%p1907_p12) }
 0xa57   : > { %1603 = sbr.rel (%p1907_p12) target bundleno = 2824 (0xb08), region = 108 }
 0xa5a   : > { %v1584_v51 = vpop.xlane.xlu0 %1583 }
 0xa5b   : > { %v1585_v52 = vadd.f32 %v1584_v51, %v1570_v50 }
 0xa5d   : > { %1587 = vst.msk [vmem:[#allocation7] sm:$0xff] %vm1586_vm6, %v1585_v52 }
 0xa64   : > { %v1605_v53 = vld [vmem:[#allocation7] sm:$0xff] }
 0xa65   : > { %2212 = vlog2.f32 %v1605_v53 }
 0xa6f   : > { %v2213_v55 = vpop.eup %2212 }
 0xa70   : > { %v1607_v58 = vmul.f32 0.6931472, %v2213_v55 }
 0xa72   : > { %v1608_v57 = vadd.f32 %v1607_v58, %v1604_v56 }
 0xa74   : > { %v1610_v61 = vmul.f32 %v1609_v59, %v1608_v57 }
 0xa76   : > { %v1612_v63 = vsub.f32 %v1610_v61, %v1611_v60 }
 0xa78   : > { %v1614_v0 = vadd.f32 %v1613_v62, %v1612_v63 }
 0xa7a   : > { %v1615_v1 = vsel %vm1586_vm6, %v1614_v0, 0.0 }
 0xa7b   : > { %v1616_v2 = vrot.slane %v1615_v1, 4 }
 0xa7d   : > { %v1617_v3 = vadd.f32 %v1616_v2, %v1615_v1 }
 0xa7f   : > { %v1618_v4 = vrot.slane %v1617_v3, 2 }
 0xa81   : > { %v1619_v5 = vadd.f32 %v1618_v4, %v1617_v3 }
 0xa83   : > { %v1620_v6 = vrot.slane %v1619_v5, 1 }
 0xa85   : > { %v1621_v7 = vadd.f32 %v1620_v6, %v1619_v5 }
 0xa87   : > { %1624 = vperm.xlu0 %2211, %v1621_v7  }
 0xb06   : > { %v1625_v8 = vpop.permute.xlu0 %1624 }
 0xb07   : > { %1627 = vst [vmem:[%s660_s12] sm:$0x1] %v1625_v8 }
 0xb08 PF: > { %s3316_s13 = sld [smem:[#allocation28_spill]]  ;;  %s3317_s4 = sld [smem:[#allocation34_spill]] }
 0xb09   : > { %s3318_s15 = sld [smem:[#allocation48_spill]]  ;;  %s1641_s8 = sshll.u32 %s660_s12, 4  ;;  %s1642_s8 = int_to_ptr.vmem [resolvable:$true] %s1641_s8 }
 0xb0a   : > { %s1629_s11 = scalar_lea.sflag [#allocation11], %s2927_s14  ;;  %s2360_s25 = scalar_lea.vmem %s1642_s8, 16 }
 0xb0b   : > { %p2361_p0 = scmp.ne.s32.totalorder %s1642_s8, %s2360_s25  ;;  %s2517_s24 = smov [#allocation18]  }
 0xb0c   : > { %s2364_s17 = sshll.u32 %s2517_s24, 4  ;;  %s2365_s17 = int_to_ptr.vmem [resolvable:$false] %s2364_s17 }
 0xb0d   : > { %s2366_s30 = scalar_lea.vmem %s2365_s17, 32  ;;  %p2367_p2 = scmp.lt.s32.totalorder %s1642_s8, %s2365_s17 }
 0xb0e   : > { %s1908_s18 = sshll.u32 %s3316_s13, 4  ;;  %p3319_p3 = scmp.ne.s32.totalorder %s3317_s4, 0 }
 0xb0f   : > { %s3140_s29 = scalar_lea.hbm %s3318_s15, %s1908_s18  ;;  %p2368_p5 = scmp.lt.s32.totalorder %s2366_s30, %s2360_s25 }
 0xb10   : > { %p2362_p6 = pnand %p2361_p0, %p3319_p3 }
 0xb11   : > { %p2369_p7 = por %p2368_p5, %p2367_p2 }
 0xb12   : > { %p2363_p10 = pneg %p2362_p6 }
 0xb14   : > { %p2370_p8 = pnand %p2369_p7, %p2363_p10 }
 0xb16   : > { %2373 = shalt.err (!%p2370_p8)
}
 0xb17   : > { %s2374_s14 = scalar_lea.hbm %s3140_s29, 16  ;;  %s2378_s9 = scalar_lea.hbm %s3318_s15, 32 }
 0xb18   : > { %p2375_p4 = scmp.ne.s32.totalorder %s3140_s29, %s2374_s14  ;;  %p2379_p1 = scmp.lt.u32.totalorder %s3140_s29, %s3318_s15 }
 0xb19   : > { %p2380_p11 = scmp.lt.u32.totalorder %s2378_s9, %s2374_s14  ;;  %p2382_p0 = scmp.lt.u32.totalorder %s2374_s14, %s3140_s29 }
 0xb1a   : > { %p2376_p9 = pnand %p2375_p4, %p3319_p3 }
 0xb1b   : > { %p2381_p12 = por %p2380_p11, %p2379_p1 }
 0xb1c   : > { %p2377_p13 = pneg %p2376_p9 }
 0xb1d   : > { %p2383_p6 = por %p2382_p0, %p2381_p12 }
 0xb1f   : > { %p2384_p10 = pnand %p2383_p6, %p2377_p13 }
 0xb21   : > { %2387 = shalt.err (!%p2384_p10)
}
 0xb22   : > { %1961 = dma.vmem_to_hbm [thread:$0]  (%p3319_p3), %s1642_s8, 16, %s3140_s29, %s1629_s11  }
 0xb23 PF: > { %s3320_s21 = sld [smem:[#allocation25_spill]]  ;;  %s3321_s13 = sld [smem:[#allocation35_spill]] }
 0xb24   : > { %p1989_p2 = scmp.ge.s32.totalorder %s2498_s28, 2 }
 0xb29   : > { %s1653_s18 = sand.u32 1, %s3320_s21   ;;  %p3322_p5 = scmp.ne.s32.totalorder %s3321_s13, 0 }
 0xb2a   : > { %s1654_s1 = scalar_lea.sflag [#allocation11], %s1653_s18 }
 0xb2b   : > { %p1981_p7 = pnand %p1989_p2, %p3322_p5 }
 0xb2d   : > { %2453 = dma.done.wait (!%p1981_p7), %s1654_s1, 16  }
 0xb2e   : > { %2455 = vsyncadd (!%p1981_p7), %s1654_s1, 4294967280  ;;  %s35_s28 = sadd.s32 1, %s2498_s28   ;;  %s3323_s5 = sld [smem:[#allocation32_spill]] }
 0xb2f   : > { %p32_p8 = scmp.ge.s32.totalorder %s35_s28, 10   ;;  %s3324_s4 = sld [smem:[#allocation26_spill]] }
 0xb30   : > { %s3325_s23 = sld [smem:[#allocation33_spill]]  ;;  %s3326_s25 = sld [smem:[#allocation29_spill]] }
 0xb31   : > { %s3327_s29 = sld [smem:[#allocation30_spill]]  ;;  %s3328_s27 = sld [smem:[#allocation31_spill]] }
 0xb32   : > { %s3329_s18 = smov %s2462_s19  ;;  %s3330_s19 = smov %s2466_s20 }
 0xb33   : > { %s3332_s21 = smov %s2474_s22  ;;  %s3334_s24 = smov %s2490_s26 }
 0xb34   : > { %s3331_s20 = smov %s3323_s5  ;;  %34 = sbr.rel (!%p32_p8) target bundleno = 26 (0x1a), region = 171 }
 0xb35   : > { %s3333_s22 = smov %s3324_s4 }
 0xb37   : > { %s3335_s26 = smov %s3327_s29 }
 0xb3b   :  { %1658 = vsyncpa [#allocation10], 1 }
 0xb3c   :  { %1660 = vsyncpa [#allocation10 + $0x1], 1 }
 0xb3d   :  { %1661 = vsyncpa [#allocation13], 1 }
 0xb3e   :  { %1663 = vsyncpa [#allocation13 + $0x1], 1 }
 0xb3f   :  { %1664 = vsyncpa [#allocation16], 1 }
 0xb40   :  { %1665 = vsyncpa [#allocation11], 1 }
 0xb41   :  { %1667 = vsyncpa [#allocation11 + $0x1], 1 }

</bundles_post_ra>
